<compile_context>
chip_gen: v7x
topology: tpu7x:2x2x1
jax: 0.10.0
libtpu: 0.0.40
codegen_flags: <defaults>
</compile_context>

<pallas_src>
import functools

import jax
import jax.numpy as jnp
from jax.experimental import pallas as pl
from jax.experimental.pallas import tpu as pltpu

EPS = 1e-5


def _recurrent_block_kernel(x_ref, w_ref, gb_ref, o_ref, *, N, C, H, W, t):
    """Fused (t+1) x [3x3 conv -> BatchNorm(train) -> ReLU] recurrence.

    Layouts (NC = N*C rows on sublanes, HW = H*W on lanes):
      x_ref  (NC, HW)     input slab = x.reshape(N*C, H*W)  (NCHW-native)
      w_ref  (NC, 9*NC)   block-diagonal per-batch im2col weights
      gb_ref (NC, 2)      column 0 = gamma, column 1 = beta (per row's channel)
      o_ref  (NC, HW)     output slab
    """
    NC, HW = x_ref.shape

    # ---- one-time loads ---------------------------------------------------
    x = x_ref[...]                                      # (NC, HW)
    wmat = w_ref[...]                                   # (NC, 9*NC)
    gb = gb_ref[...]                                    # (NC, 2)
    gamma = jnp.broadcast_to(gb[:, 0:1], (NC, HW))      # hoisted broadcasts
    beta = jnp.broadcast_to(gb[:, 1:2], (NC, HW))

    # ---- hoisted, step-invariant constants ---------------------------------
    # Each row of (NC, HW) is one image, so for a 3x3/stride-1/pad-1 conv a
    # cyclic lane roll by dy*W+dx plus an in-image 0/1 mask == zero padding.
    offsets = [(dy, dx) for dy in (-1, 0, 1) for dx in (-1, 0, 1)]

    pos = jax.lax.broadcasted_iota(jnp.int32, (1, HW), 1).astype(jnp.float32)
    hh = jnp.floor((pos + 0.5) * (1.0 / W))             # row index (exact)
    ww = pos - hh * W                                    # col index (exact)
    masks = []                                           # per-tap (NC, HW) 0/1
    for (dy, dx) in offsets:
        if dy == 0 and dx == 0:
            masks.append(None)                           # center tap: no mask
        else:
            ok = ((hh + dy >= 0.0) & (hh + dy <= H - 1.0)
                  & (ww + dx >= 0.0) & (ww + dx <= W - 1.0))
            masks.append(jnp.broadcast_to(
                jnp.where(ok, 1.0, 0.0).astype(jnp.float32), (NC, HW)))

    # Channel-aggregation matrix: agg[r, r'] = 1/(N*HW) iff rows r, r' hold the
    # same channel (r == r' mod C). Used to reduce BN stats over the batch rows.
    ri = jax.lax.broadcasted_iota(jnp.int32, (NC, NC), 0)
    rj = jax.lax.broadcasted_iota(jnp.int32, (NC, NC), 1)
    diff = ri - rj
    same_ch = diff == 0
    for n in range(1, N):
        same_ch = same_ch | (diff == n * C) | (diff == -(n * C))
    agg = jnp.where(same_ch, 1.0 / (N * HW), 0.0).astype(jnp.float32)

    def cbr(y):
        # --- im2col: 9 masked lane-rolled taps stacked on the contraction axis.
        taps = []
        for k, (dy, dx) in enumerate(offsets):
            s = dy * W + dx
            if s == 0:
                taps.append(y)
            else:
                rolled = pltpu.roll(y, shift=(-s) % HW, axis=1)  # tap[p]=y[p+s]
                taps.append(rolled * masks[k])
        col = jnp.concatenate(taps, axis=0)                      # (9*NC, HW)

        # --- Conv2d(C, C, 3, padding=1): single MXU matmul (block-diag weights).
        # Conv bias intentionally omitted: training-mode BatchNorm subtracts the
        # per-channel batch mean, which cancels a per-channel constant exactly.
        acc = jnp.dot(wmat, col, preferred_element_type=jnp.float32)  # (NC, HW)

        # --- BatchNorm2d (training): per-channel stats over N,H,W, two-pass var.
        mean = jnp.sum(jnp.dot(agg, acc, preferred_element_type=jnp.float32),
                       axis=1, keepdims=True)                         # (NC, 1)
        d = acc - mean
        var = jnp.sum(jnp.dot(agg, d * d, preferred_element_type=jnp.float32),
                      axis=1, keepdims=True)                          # (NC, 1)
        xhat = d * jax.lax.rsqrt(var + EPS)

        # --- affine + ReLU
        return jnp.maximum(xhat * gamma + beta, 0.0)

    x1 = cbr(x)                     # step 0 peeled: CBR(x), no zero tensor
    for _ in range(t):
        x1 = cbr(x + x1)            # CBR(x + x1), t times   (total t+1 CBRs)

    o_ref[...] = x1                 # (NC, HW): lane-dense store (HW % 128 == 0)


@functools.partial(jax.jit, static_argnames=("t",))
def recurrent_block_forward(x_nchw, w, b, gamma, beta, t=2):
    """Forward pass of Recurrent_block.

    x_nchw: (N, C, H, W) float32 (PyTorch layout)
    w:      (3, 3, C_in, C_out) conv weight (HWIO)
    b:      (C,) conv bias (mathematically cancelled by training-mode BN)
    gamma, beta: (C,) BatchNorm affine parameters
    Returns (N, C, H, W) float32.
    """
    N, C, H, W = x_nchw.shape
    NC, HW = N * C, H * W
    del b  # no-op under training-mode BatchNorm (mean subtraction cancels it)

    # NCHW-native 2-D view: pure reshape, no transpose pass over the activation.
    x2 = x_nchw.astype(jnp.float32).reshape(NC, HW)

    # Block-diagonal (per-batch-image) im2col weights: (NC, 9*NC), where
    # column index = k*(N*C) + n*C + c_in matches the kernel's tap stacking.
    w_t = jnp.transpose(w, (3, 0, 1, 2)).reshape(C, 9, C).astype(jnp.float32)
    eye = jnp.eye(N, dtype=jnp.float32)
    w_big = jnp.einsum("nm,oki->nokmi", eye, w_t).reshape(NC, 9 * NC)

    # gamma/beta packed into a single tiny input: row n*C+c -> (gamma[c], beta[c]).
    gb = jnp.stack([jnp.tile(gamma.astype(jnp.float32), N),
                    jnp.tile(beta.astype(jnp.float32), N)], axis=1)   # (NC, 2)

    vmem = pl.BlockSpec(memory_space=pltpu.MemorySpace.VMEM)
    out2 = pl.pallas_call(
        functools.partial(_recurrent_block_kernel, N=N, C=C, H=H, W=W, t=t),
        out_shape=jax.ShapeDtypeStruct((NC, HW), jnp.float32),
        in_specs=[vmem, vmem, vmem],
        out_specs=vmem,
    )(x2, w_big, gb)

    return out2.reshape(N, C, H, W)


def _reference(x_nchw, w, b, gamma, beta, t):
    """Pure-JAX reference, faithful to the PyTorch module (training-mode BN)."""
    def cbr(y):
        z = jax.lax.conv_general_dilated(
            y, w, window_strides=(1, 1), padding=((1, 1), (1, 1)),
            dimension_numbers=("NCHW", "HWIO", "NCHW"),
            precision=jax.lax.Precision.HIGHEST)
        z = z + b.reshape(1, -1, 1, 1)
        mean = jnp.mean(z, axis=(0, 2, 3), keepdims=True)
        var = jnp.mean((z - mean) ** 2, axis=(0, 2, 3), keepdims=True)
        zn = (z - mean) * jax.lax.rsqrt(var + EPS)
        return jnp.maximum(zn * gamma.reshape(1, -1, 1, 1)
                           + beta.reshape(1, -1, 1, 1), 0.0)

    x1 = None
    for i in range(t):
        if i == 0:
            x1 = cbr(x_nchw)
        x1 = cbr(x_nchw + x1)
    return x1


if __name__ == "__main__":
    N, C, H, W = 2, 4, 16, 16
    t = 2

    key = jax.random.PRNGKey(0)
    kx, kw, kb = jax.random.split(key, 3)
    w = jax.random.normal(kw, (3, 3, C, C), jnp.float32) * 0.1   # (kh, kw, Cin, Cout)
    b = jax.random.normal(kb, (C,), jnp.float32) * 0.1
    gamma = jnp.ones((C,), jnp.float32)
    beta = jnp.zeros((C,), jnp.float32)
    x = jax.random.normal(kx, (N, C, H, W), jnp.float32)         # NCHW like PyTorch

    out = jax.block_until_ready(recurrent_block_forward(x, w, b, gamma, beta, t=t))
    assert out.shape == (N, C, H, W)

    # Correctness check against a pure-JAX reference of the PyTorch module.
    ref = _reference(x, w, b, gamma, beta, t)
    max_err = float(jnp.max(jnp.abs(out - ref)))
    assert max_err < 2e-3, f"kernel/reference mismatch: max |err| = {max_err}"
    print("KERNEL_OK")
</pallas_src>

<mosaic_0001>
module attributes {stable_mosaic.version = 11 : i64} {
  func.func @_recurrent_block_kernel(%arg0: memref<8x256xf32, #tpu.memory_space<vmem>>, %arg1: memref<8x72xf32, #tpu.memory_space<vmem>>, %arg2: memref<8x2xf32, #tpu.memory_space<vmem>>, %arg3: memref<8x256xf32, #tpu.memory_space<vmem>>) attributes {dimension_semantics = [], scalar_prefetch = 0 : i64, scratch_operands = 0 : i64, tpu.core_type = #tpu.core_type<tc>} {
    %c0 = arith.constant 0 : index
    %c0_0 = arith.constant 0 : index
    %0 = vector.load %arg0[%c0, %c0_0] : memref<8x256xf32, #tpu.memory_space<vmem>>, vector<8x256xf32>
    %c0_1 = arith.constant 0 : index
    %c0_2 = arith.constant 0 : index
    %1 = vector.load %arg1[%c0_1, %c0_2] : memref<8x72xf32, #tpu.memory_space<vmem>>, vector<8x72xf32>
    %c0_3 = arith.constant 0 : index
    %c0_4 = arith.constant 0 : index
    %2 = vector.load %arg2[%c0_3, %c0_4] : memref<8x2xf32, #tpu.memory_space<vmem>>, vector<8x2xf32>
    %3 = vector.extract_strided_slice %2 {offsets = [0, 0], sizes = [8, 1], strides = [1, 1]} : vector<8x2xf32> to vector<8x1xf32>
    %4 = vector.shape_cast %3 : vector<8x1xf32> to vector<8x1xf32>
    %5 = vector.broadcast %4 : vector<8x1xf32> to vector<8x256xf32>
    %6 = vector.extract_strided_slice %2 {offsets = [0, 1], sizes = [8, 1], strides = [1, 1]} : vector<8x2xf32> to vector<8x1xf32>
    %7 = vector.shape_cast %6 : vector<8x1xf32> to vector<8x1xf32>
    %8 = vector.broadcast %7 : vector<8x1xf32> to vector<8x256xf32>
    %9 = tpu.iota {dimensions = array<i32: 1>} : vector<1x256xi32>
    %10 = arith.sitofp %9 : vector<1x256xi32> to vector<1x256xf32>
    %cst = arith.constant 5.000000e-01 : f32
    %11 = vector.broadcast %cst : f32 to vector<1x256xf32>
    %12 = arith.addf %10, %11 : vector<1x256xf32>
    %cst_5 = arith.constant 6.250000e-02 : f32
    %13 = vector.broadcast %cst_5 : f32 to vector<1x256xf32>
    %14 = arith.mulf %12, %13 : vector<1x256xf32>
    %15 = math.floor %14 : vector<1x256xf32>
    %cst_6 = arith.constant 1.600000e+01 : f32
    %16 = vector.broadcast %cst_6 : f32 to vector<1x256xf32>
    %17 = arith.mulf %15, %16 : vector<1x256xf32>
    %18 = arith.subf %10, %17 : vector<1x256xf32>
    %cst_7 = arith.constant -1.000000e+00 : f32
    %19 = vector.broadcast %cst_7 : f32 to vector<1x256xf32>
    %20 = arith.addf %15, %19 : vector<1x256xf32>
    %cst_8 = arith.constant 0.000000e+00 : f32
    %21 = vector.broadcast %cst_8 : f32 to vector<1x256xf32>
    %22 = arith.cmpf oge, %20, %21 : vector<1x256xf32>
    %cst_9 = arith.constant -1.000000e+00 : f32
    %23 = vector.broadcast %cst_9 : f32 to vector<1x256xf32>
    %24 = arith.addf %15, %23 : vector<1x256xf32>
    %cst_10 = arith.constant 1.500000e+01 : f32
    %25 = vector.broadcast %cst_10 : f32 to vector<1x256xf32>
    %26 = arith.cmpf ole, %24, %25 : vector<1x256xf32>
    %27 = arith.andi %22, %26 : vector<1x256xi1>
    %cst_11 = arith.constant -1.000000e+00 : f32
    %28 = vector.broadcast %cst_11 : f32 to vector<1x256xf32>
    %29 = arith.addf %18, %28 : vector<1x256xf32>
    %cst_12 = arith.constant 0.000000e+00 : f32
    %30 = vector.broadcast %cst_12 : f32 to vector<1x256xf32>
    %31 = arith.cmpf oge, %29, %30 : vector<1x256xf32>
    %32 = arith.andi %27, %31 : vector<1x256xi1>
    %cst_13 = arith.constant -1.000000e+00 : f32
    %33 = vector.broadcast %cst_13 : f32 to vector<1x256xf32>
    %34 = arith.addf %18, %33 : vector<1x256xf32>
    %cst_14 = arith.constant 1.500000e+01 : f32
    %35 = vector.broadcast %cst_14 : f32 to vector<1x256xf32>
    %36 = arith.cmpf ole, %34, %35 : vector<1x256xf32>
    %37 = arith.andi %32, %36 : vector<1x256xi1>
    %cst_15 = arith.constant 1.000000e+00 : f32
    %cst_16 = arith.constant 0.000000e+00 : f32
    %38 = vector.broadcast %cst_15 : f32 to vector<1x256xf32>
    %39 = vector.broadcast %cst_16 : f32 to vector<1x256xf32>
    %40 = arith.select %37, %38, %39 : vector<1x256xi1>, vector<1x256xf32>
    %41 = vector.shape_cast %40 : vector<1x256xf32> to vector<1x256xf32>
    %42 = vector.broadcast %41 : vector<1x256xf32> to vector<8x256xf32>
    %cst_17 = arith.constant -1.000000e+00 : f32
    %43 = vector.broadcast %cst_17 : f32 to vector<1x256xf32>
    %44 = arith.addf %15, %43 : vector<1x256xf32>
    %cst_18 = arith.constant 0.000000e+00 : f32
    %45 = vector.broadcast %cst_18 : f32 to vector<1x256xf32>
    %46 = arith.cmpf oge, %44, %45 : vector<1x256xf32>
    %cst_19 = arith.constant -1.000000e+00 : f32
    %47 = vector.broadcast %cst_19 : f32 to vector<1x256xf32>
    %48 = arith.addf %15, %47 : vector<1x256xf32>
    %cst_20 = arith.constant 1.500000e+01 : f32
    %49 = vector.broadcast %cst_20 : f32 to vector<1x256xf32>
    %50 = arith.cmpf ole, %48, %49 : vector<1x256xf32>
    %51 = arith.andi %46, %50 : vector<1x256xi1>
    %cst_21 = arith.constant 0.000000e+00 : f32
    %52 = vector.broadcast %cst_21 : f32 to vector<1x256xf32>
    %53 = arith.addf %18, %52 : vector<1x256xf32>
    %cst_22 = arith.constant 0.000000e+00 : f32
    %54 = vector.broadcast %cst_22 : f32 to vector<1x256xf32>
    %55 = arith.cmpf oge, %53, %54 : vector<1x256xf32>
    %56 = arith.andi %51, %55 : vector<1x256xi1>
    %cst_23 = arith.constant 0.000000e+00 : f32
    %57 = vector.broadcast %cst_23 : f32 to vector<1x256xf32>
    %58 = arith.addf %18, %57 : vector<1x256xf32>
    %cst_24 = arith.constant 1.500000e+01 : f32
    %59 = vector.broadcast %cst_24 : f32 to vector<1x256xf32>
    %60 = arith.cmpf ole, %58, %59 : vector<1x256xf32>
    %61 = arith.andi %56, %60 : vector<1x256xi1>
    %cst_25 = arith.constant 1.000000e+00 : f32
    %cst_26 = arith.constant 0.000000e+00 : f32
    %62 = vector.broadcast %cst_25 : f32 to vector<1x256xf32>
    %63 = vector.broadcast %cst_26 : f32 to vector<1x256xf32>
    %64 = arith.select %61, %62, %63 : vector<1x256xi1>, vector<1x256xf32>
    %65 = vector.shape_cast %64 : vector<1x256xf32> to vector<1x256xf32>
    %66 = vector.broadcast %65 : vector<1x256xf32> to vector<8x256xf32>
    %cst_27 = arith.constant -1.000000e+00 : f32
    %67 = vector.broadcast %cst_27 : f32 to vector<1x256xf32>
    %68 = arith.addf %15, %67 : vector<1x256xf32>
    %cst_28 = arith.constant 0.000000e+00 : f32
    %69 = vector.broadcast %cst_28 : f32 to vector<1x256xf32>
    %70 = arith.cmpf oge, %68, %69 : vector<1x256xf32>
    %cst_29 = arith.constant -1.000000e+00 : f32
    %71 = vector.broadcast %cst_29 : f32 to vector<1x256xf32>
    %72 = arith.addf %15, %71 : vector<1x256xf32>
    %cst_30 = arith.constant 1.500000e+01 : f32
    %73 = vector.broadcast %cst_30 : f32 to vector<1x256xf32>
    %74 = arith.cmpf ole, %72, %73 : vector<1x256xf32>
    %75 = arith.andi %70, %74 : vector<1x256xi1>
    %cst_31 = arith.constant 1.000000e+00 : f32
    %76 = vector.broadcast %cst_31 : f32 to vector<1x256xf32>
    %77 = arith.addf %18, %76 : vector<1x256xf32>
    %cst_32 = arith.constant 0.000000e+00 : f32
    %78 = vector.broadcast %cst_32 : f32 to vector<1x256xf32>
    %79 = arith.cmpf oge, %77, %78 : vector<1x256xf32>
    %80 = arith.andi %75, %79 : vector<1x256xi1>
    %cst_33 = arith.constant 1.000000e+00 : f32
    %81 = vector.broadcast %cst_33 : f32 to vector<1x256xf32>
    %82 = arith.addf %18, %81 : vector<1x256xf32>
    %cst_34 = arith.constant 1.500000e+01 : f32
    %83 = vector.broadcast %cst_34 : f32 to vector<1x256xf32>
    %84 = arith.cmpf ole, %82, %83 : vector<1x256xf32>
    %85 = arith.andi %80, %84 : vector<1x256xi1>
    %cst_35 = arith.constant 1.000000e+00 : f32
    %cst_36 = arith.constant 0.000000e+00 : f32
    %86 = vector.broadcast %cst_35 : f32 to vector<1x256xf32>
    %87 = vector.broadcast %cst_36 : f32 to vector<1x256xf32>
    %88 = arith.select %85, %86, %87 : vector<1x256xi1>, vector<1x256xf32>
    %89 = vector.shape_cast %88 : vector<1x256xf32> to vector<1x256xf32>
    %90 = vector.broadcast %89 : vector<1x256xf32> to vector<8x256xf32>
    %cst_37 = arith.constant 0.000000e+00 : f32
    %91 = vector.broadcast %cst_37 : f32 to vector<1x256xf32>
    %92 = arith.addf %15, %91 : vector<1x256xf32>
    %cst_38 = arith.constant 0.000000e+00 : f32
    %93 = vector.broadcast %cst_38 : f32 to vector<1x256xf32>
    %94 = arith.cmpf oge, %92, %93 : vector<1x256xf32>
    %cst_39 = arith.constant 0.000000e+00 : f32
    %95 = vector.broadcast %cst_39 : f32 to vector<1x256xf32>
    %96 = arith.addf %15, %95 : vector<1x256xf32>
    %cst_40 = arith.constant 1.500000e+01 : f32
    %97 = vector.broadcast %cst_40 : f32 to vector<1x256xf32>
    %98 = arith.cmpf ole, %96, %97 : vector<1x256xf32>
    %99 = arith.andi %94, %98 : vector<1x256xi1>
    %cst_41 = arith.constant -1.000000e+00 : f32
    %100 = vector.broadcast %cst_41 : f32 to vector<1x256xf32>
    %101 = arith.addf %18, %100 : vector<1x256xf32>
    %cst_42 = arith.constant 0.000000e+00 : f32
    %102 = vector.broadcast %cst_42 : f32 to vector<1x256xf32>
    %103 = arith.cmpf oge, %101, %102 : vector<1x256xf32>
    %104 = arith.andi %99, %103 : vector<1x256xi1>
    %cst_43 = arith.constant -1.000000e+00 : f32
    %105 = vector.broadcast %cst_43 : f32 to vector<1x256xf32>
    %106 = arith.addf %18, %105 : vector<1x256xf32>
    %cst_44 = arith.constant 1.500000e+01 : f32
    %107 = vector.broadcast %cst_44 : f32 to vector<1x256xf32>
    %108 = arith.cmpf ole, %106, %107 : vector<1x256xf32>
    %109 = arith.andi %104, %108 : vector<1x256xi1>
    %cst_45 = arith.constant 1.000000e+00 : f32
    %cst_46 = arith.constant 0.000000e+00 : f32
    %110 = vector.broadcast %cst_45 : f32 to vector<1x256xf32>
    %111 = vector.broadcast %cst_46 : f32 to vector<1x256xf32>
    %112 = arith.select %109, %110, %111 : vector<1x256xi1>, vector<1x256xf32>
    %113 = vector.shape_cast %112 : vector<1x256xf32> to vector<1x256xf32>
    %114 = vector.broadcast %113 : vector<1x256xf32> to vector<8x256xf32>
    %cst_47 = arith.constant 0.000000e+00 : f32
    %115 = vector.broadcast %cst_47 : f32 to vector<1x256xf32>
    %116 = arith.addf %15, %115 : vector<1x256xf32>
    %cst_48 = arith.constant 0.000000e+00 : f32
    %117 = vector.broadcast %cst_48 : f32 to vector<1x256xf32>
    %118 = arith.cmpf oge, %116, %117 : vector<1x256xf32>
    %cst_49 = arith.constant 0.000000e+00 : f32
    %119 = vector.broadcast %cst_49 : f32 to vector<1x256xf32>
    %120 = arith.addf %15, %119 : vector<1x256xf32>
    %cst_50 = arith.constant 1.500000e+01 : f32
    %121 = vector.broadcast %cst_50 : f32 to vector<1x256xf32>
    %122 = arith.cmpf ole, %120, %121 : vector<1x256xf32>
    %123 = arith.andi %118, %122 : vector<1x256xi1>
    %cst_51 = arith.constant 1.000000e+00 : f32
    %124 = vector.broadcast %cst_51 : f32 to vector<1x256xf32>
    %125 = arith.addf %18, %124 : vector<1x256xf32>
    %cst_52 = arith.constant 0.000000e+00 : f32
    %126 = vector.broadcast %cst_52 : f32 to vector<1x256xf32>
    %127 = arith.cmpf oge, %125, %126 : vector<1x256xf32>
    %128 = arith.andi %123, %127 : vector<1x256xi1>
    %cst_53 = arith.constant 1.000000e+00 : f32
    %129 = vector.broadcast %cst_53 : f32 to vector<1x256xf32>
    %130 = arith.addf %18, %129 : vector<1x256xf32>
    %cst_54 = arith.constant 1.500000e+01 : f32
    %131 = vector.broadcast %cst_54 : f32 to vector<1x256xf32>
    %132 = arith.cmpf ole, %130, %131 : vector<1x256xf32>
    %133 = arith.andi %128, %132 : vector<1x256xi1>
    %cst_55 = arith.constant 1.000000e+00 : f32
    %cst_56 = arith.constant 0.000000e+00 : f32
    %134 = vector.broadcast %cst_55 : f32 to vector<1x256xf32>
    %135 = vector.broadcast %cst_56 : f32 to vector<1x256xf32>
    %136 = arith.select %133, %134, %135 : vector<1x256xi1>, vector<1x256xf32>
    %137 = vector.shape_cast %136 : vector<1x256xf32> to vector<1x256xf32>
    %138 = vector.broadcast %137 : vector<1x256xf32> to vector<8x256xf32>
    %cst_57 = arith.constant 1.000000e+00 : f32
    %139 = vector.broadcast %cst_57 : f32 to vector<1x256xf32>
    %140 = arith.addf %15, %139 : vector<1x256xf32>
    %cst_58 = arith.constant 0.000000e+00 : f32
    %141 = vector.broadcast %cst_58 : f32 to vector<1x256xf32>
    %142 = arith.cmpf oge, %140, %141 : vector<1x256xf32>
    %cst_59 = arith.constant 1.000000e+00 : f32
    %143 = vector.broadcast %cst_59 : f32 to vector<1x256xf32>
    %144 = arith.addf %15, %143 : vector<1x256xf32>
    %cst_60 = arith.constant 1.500000e+01 : f32
    %145 = vector.broadcast %cst_60 : f32 to vector<1x256xf32>
    %146 = arith.cmpf ole, %144, %145 : vector<1x256xf32>
    %147 = arith.andi %142, %146 : vector<1x256xi1>
    %cst_61 = arith.constant -1.000000e+00 : f32
    %148 = vector.broadcast %cst_61 : f32 to vector<1x256xf32>
    %149 = arith.addf %18, %148 : vector<1x256xf32>
    %cst_62 = arith.constant 0.000000e+00 : f32
    %150 = vector.broadcast %cst_62 : f32 to vector<1x256xf32>
    %151 = arith.cmpf oge, %149, %150 : vector<1x256xf32>
    %152 = arith.andi %147, %151 : vector<1x256xi1>
    %cst_63 = arith.constant -1.000000e+00 : f32
    %153 = vector.broadcast %cst_63 : f32 to vector<1x256xf32>
    %154 = arith.addf %18, %153 : vector<1x256xf32>
    %cst_64 = arith.constant 1.500000e+01 : f32
    %155 = vector.broadcast %cst_64 : f32 to vector<1x256xf32>
    %156 = arith.cmpf ole, %154, %155 : vector<1x256xf32>
    %157 = arith.andi %152, %156 : vector<1x256xi1>
    %cst_65 = arith.constant 1.000000e+00 : f32
    %cst_66 = arith.constant 0.000000e+00 : f32
    %158 = vector.broadcast %cst_65 : f32 to vector<1x256xf32>
    %159 = vector.broadcast %cst_66 : f32 to vector<1x256xf32>
    %160 = arith.select %157, %158, %159 : vector<1x256xi1>, vector<1x256xf32>
    %161 = vector.shape_cast %160 : vector<1x256xf32> to vector<1x256xf32>
    %162 = vector.broadcast %161 : vector<1x256xf32> to vector<8x256xf32>
    %cst_67 = arith.constant 1.000000e+00 : f32
    %163 = vector.broadcast %cst_67 : f32 to vector<1x256xf32>
    %164 = arith.addf %15, %163 : vector<1x256xf32>
    %cst_68 = arith.constant 0.000000e+00 : f32
    %165 = vector.broadcast %cst_68 : f32 to vector<1x256xf32>
    %166 = arith.cmpf oge, %164, %165 : vector<1x256xf32>
    %cst_69 = arith.constant 1.000000e+00 : f32
    %167 = vector.broadcast %cst_69 : f32 to vector<1x256xf32>
    %168 = arith.addf %15, %167 : vector<1x256xf32>
    %cst_70 = arith.constant 1.500000e+01 : f32
    %169 = vector.broadcast %cst_70 : f32 to vector<1x256xf32>
    %170 = arith.cmpf ole, %168, %169 : vector<1x256xf32>
    %171 = arith.andi %166, %170 : vector<1x256xi1>
    %cst_71 = arith.constant 0.000000e+00 : f32
    %172 = vector.broadcast %cst_71 : f32 to vector<1x256xf32>
    %173 = arith.addf %18, %172 : vector<1x256xf32>
    %cst_72 = arith.constant 0.000000e+00 : f32
    %174 = vector.broadcast %cst_72 : f32 to vector<1x256xf32>
    %175 = arith.cmpf oge, %173, %174 : vector<1x256xf32>
    %176 = arith.andi %171, %175 : vector<1x256xi1>
    %cst_73 = arith.constant 0.000000e+00 : f32
    %177 = vector.broadcast %cst_73 : f32 to vector<1x256xf32>
    %178 = arith.addf %18, %177 : vector<1x256xf32>
    %cst_74 = arith.constant 1.500000e+01 : f32
    %179 = vector.broadcast %cst_74 : f32 to vector<1x256xf32>
    %180 = arith.cmpf ole, %178, %179 : vector<1x256xf32>
    %181 = arith.andi %176, %180 : vector<1x256xi1>
    %cst_75 = arith.constant 1.000000e+00 : f32
    %cst_76 = arith.constant 0.000000e+00 : f32
    %182 = vector.broadcast %cst_75 : f32 to vector<1x256xf32>
    %183 = vector.broadcast %cst_76 : f32 to vector<1x256xf32>
    %184 = arith.select %181, %182, %183 : vector<1x256xi1>, vector<1x256xf32>
    %185 = vector.shape_cast %184 : vector<1x256xf32> to vector<1x256xf32>
    %186 = vector.broadcast %185 : vector<1x256xf32> to vector<8x256xf32>
    %cst_77 = arith.constant 1.000000e+00 : f32
    %187 = vector.broadcast %cst_77 : f32 to vector<1x256xf32>
    %188 = arith.addf %15, %187 : vector<1x256xf32>
    %cst_78 = arith.constant 0.000000e+00 : f32
    %189 = vector.broadcast %cst_78 : f32 to vector<1x256xf32>
    %190 = arith.cmpf oge, %188, %189 : vector<1x256xf32>
    %cst_79 = arith.constant 1.000000e+00 : f32
    %191 = vector.broadcast %cst_79 : f32 to vector<1x256xf32>
    %192 = arith.addf %15, %191 : vector<1x256xf32>
    %cst_80 = arith.constant 1.500000e+01 : f32
    %193 = vector.broadcast %cst_80 : f32 to vector<1x256xf32>
    %194 = arith.cmpf ole, %192, %193 : vector<1x256xf32>
    %195 = arith.andi %190, %194 : vector<1x256xi1>
    %cst_81 = arith.constant 1.000000e+00 : f32
    %196 = vector.broadcast %cst_81 : f32 to vector<1x256xf32>
    %197 = arith.addf %18, %196 : vector<1x256xf32>
    %cst_82 = arith.constant 0.000000e+00 : f32
    %198 = vector.broadcast %cst_82 : f32 to vector<1x256xf32>
    %199 = arith.cmpf oge, %197, %198 : vector<1x256xf32>
    %200 = arith.andi %195, %199 : vector<1x256xi1>
    %cst_83 = arith.constant 1.000000e+00 : f32
    %201 = vector.broadcast %cst_83 : f32 to vector<1x256xf32>
    %202 = arith.addf %18, %201 : vector<1x256xf32>
    %cst_84 = arith.constant 1.500000e+01 : f32
    %203 = vector.broadcast %cst_84 : f32 to vector<1x256xf32>
    %204 = arith.cmpf ole, %202, %203 : vector<1x256xf32>
    %205 = arith.andi %200, %204 : vector<1x256xi1>
    %cst_85 = arith.constant 1.000000e+00 : f32
    %cst_86 = arith.constant 0.000000e+00 : f32
    %206 = vector.broadcast %cst_85 : f32 to vector<1x256xf32>
    %207 = vector.broadcast %cst_86 : f32 to vector<1x256xf32>
    %208 = arith.select %205, %206, %207 : vector<1x256xi1>, vector<1x256xf32>
    %209 = vector.shape_cast %208 : vector<1x256xf32> to vector<1x256xf32>
    %210 = vector.broadcast %209 : vector<1x256xf32> to vector<8x256xf32>
    %211 = tpu.iota {dimensions = array<i32: 0>} : vector<8x8xi32>
    %212 = tpu.iota {dimensions = array<i32: 1>} : vector<8x8xi32>
    %213 = arith.subi %211, %212 : vector<8x8xi32>
    %c0_i32 = arith.constant 0 : i32
    %214 = vector.broadcast %c0_i32 : i32 to vector<8x8xi32>
    %215 = arith.cmpi eq, %213, %214 : vector<8x8xi32>
    %c4_i32 = arith.constant 4 : i32
    %216 = vector.broadcast %c4_i32 : i32 to vector<8x8xi32>
    %217 = arith.cmpi eq, %213, %216 : vector<8x8xi32>
    %218 = arith.ori %215, %217 : vector<8x8xi1>
    %c-4_i32 = arith.constant -4 : i32
    %219 = vector.broadcast %c-4_i32 : i32 to vector<8x8xi32>
    %220 = arith.cmpi eq, %213, %219 : vector<8x8xi32>
    %221 = arith.ori %218, %220 : vector<8x8xi1>
    %cst_87 = arith.constant 0.001953125 : f32
    %cst_88 = arith.constant 0.000000e+00 : f32
    %222 = vector.broadcast %cst_87 : f32 to vector<8x8xf32>
    %223 = vector.broadcast %cst_88 : f32 to vector<8x8xf32>
    %224 = arith.select %221, %222, %223 : vector<8x8xi1>, vector<8x8xf32>
    %c17_i32 = arith.constant 17 : i32
    %225 = tpu.dynamic_rotate %0 by %c17_i32 dim 1 : vector<8x256xf32>, i32 -> vector<8x256xf32>
    %226 = arith.mulf %225, %42 : vector<8x256xf32>
    %c16_i32 = arith.constant 16 : i32
    %227 = tpu.dynamic_rotate %0 by %c16_i32 dim 1 : vector<8x256xf32>, i32 -> vector<8x256xf32>
    %228 = arith.mulf %227, %66 : vector<8x256xf32>
    %c15_i32 = arith.constant 15 : i32
    %229 = tpu.dynamic_rotate %0 by %c15_i32 dim 1 : vector<8x256xf32>, i32 -> vector<8x256xf32>
    %230 = arith.mulf %229, %90 : vector<8x256xf32>
    %c1_i32 = arith.constant 1 : i32
    %231 = tpu.dynamic_rotate %0 by %c1_i32 dim 1 : vector<8x256xf32>, i32 -> vector<8x256xf32>
    %232 = arith.mulf %231, %114 : vector<8x256xf32>
    %c255_i32 = arith.constant 255 : i32
    %233 = tpu.dynamic_rotate %0 by %c255_i32 dim 1 : vector<8x256xf32>, i32 -> vector<8x256xf32>
    %234 = arith.mulf %233, %138 : vector<8x256xf32>
    %c241_i32 = arith.constant 241 : i32
    %235 = tpu.dynamic_rotate %0 by %c241_i32 dim 1 : vector<8x256xf32>, i32 -> vector<8x256xf32>
    %236 = arith.mulf %235, %162 : vector<8x256xf32>
    %c240_i32 = arith.constant 240 : i32
    %237 = tpu.dynamic_rotate %0 by %c240_i32 dim 1 : vector<8x256xf32>, i32 -> vector<8x256xf32>
    %238 = arith.mulf %237, %186 : vector<8x256xf32>
    %c239_i32 = arith.constant 239 : i32
    %239 = tpu.dynamic_rotate %0 by %c239_i32 dim 1 : vector<8x256xf32>, i32 -> vector<8x256xf32>
    %240 = arith.mulf %239, %210 : vector<8x256xf32>
    %241 = tpu.concatenate %226, %228, %230, %232, %0, %234, %236, %238, %240 in 0 : vector<8x256xf32>, vector<8x256xf32>, vector<8x256xf32>, vector<8x256xf32>, vector<8x256xf32>, vector<8x256xf32>, vector<8x256xf32>, vector<8x256xf32>, vector<8x256xf32> -> vector<72x256xf32>
    %cst_89 = arith.constant dense<0.000000e+00> : vector<8x256xf32>
    %242 = tpu.matmul %1, %241, %cst_89 {dimension_numbers = #tpu.dot_dimension_numbers<[1], [0], [0], [1], [0, 0, 1, 1], [], []>} : vector<8x72xf32>, vector<72x256xf32>, vector<8x256xf32> -> vector<8x256xf32>
    %cst_90 = arith.constant dense<0.000000e+00> : vector<8x256xf32>
    %243 = tpu.matmul %224, %242, %cst_90 {dimension_numbers = #tpu.dot_dimension_numbers<[1], [0], [0], [1], [0, 0, 1, 1], [], []>} : vector<8x8xf32>, vector<8x256xf32>, vector<8x256xf32> -> vector<8x256xf32>
    %cst_91 = arith.constant dense<0.000000e+00> : vector<8xf32>
    %244 = vector.multi_reduction <add>, %243, %cst_91 [1] : vector<8x256xf32> to vector<8xf32>
    %245 = vector.shape_cast %244 : vector<8xf32> to vector<8x1xf32>
    %246 = vector.broadcast %245 : vector<8x1xf32> to vector<8x256xf32>
    %247 = arith.subf %242, %246 : vector<8x256xf32>
    %248 = arith.mulf %247, %247 : vector<8x256xf32>
    %cst_92 = arith.constant dense<0.000000e+00> : vector<8x256xf32>
    %249 = tpu.matmul %224, %248, %cst_92 {dimension_numbers = #tpu.dot_dimension_numbers<[1], [0], [0], [1], [0, 0, 1, 1], [], []>} : vector<8x8xf32>, vector<8x256xf32>, vector<8x256xf32> -> vector<8x256xf32>
    %cst_93 = arith.constant dense<0.000000e+00> : vector<8xf32>
    %250 = vector.multi_reduction <add>, %249, %cst_93 [1] : vector<8x256xf32> to vector<8xf32>
    %251 = vector.shape_cast %250 : vector<8xf32> to vector<8x1xf32>
    %cst_94 = arith.constant 9.99999974E-6 : f32
    %252 = vector.broadcast %cst_94 : f32 to vector<8x1xf32>
    %253 = arith.addf %251, %252 : vector<8x1xf32>
    %254 = math.rsqrt %253 : vector<8x1xf32>
    %255 = vector.broadcast %254 : vector<8x1xf32> to vector<8x256xf32>
    %256 = arith.mulf %247, %255 : vector<8x256xf32>
    %257 = arith.mulf %256, %5 : vector<8x256xf32>
    %258 = arith.addf %257, %8 : vector<8x256xf32>
    %cst_95 = arith.constant 0.000000e+00 : f32
    %259 = vector.broadcast %cst_95 : f32 to vector<8x256xf32>
    %260 = arith.maximumf %258, %259 : vector<8x256xf32>
    %261 = arith.addf %0, %260 : vector<8x256xf32>
    %c17_i32_96 = arith.constant 17 : i32
    %262 = tpu.dynamic_rotate %261 by %c17_i32_96 dim 1 : vector<8x256xf32>, i32 -> vector<8x256xf32>
    %263 = arith.mulf %262, %42 : vector<8x256xf32>
    %c16_i32_97 = arith.constant 16 : i32
    %264 = tpu.dynamic_rotate %261 by %c16_i32_97 dim 1 : vector<8x256xf32>, i32 -> vector<8x256xf32>
    %265 = arith.mulf %264, %66 : vector<8x256xf32>
    %c15_i32_98 = arith.constant 15 : i32
    %266 = tpu.dynamic_rotate %261 by %c15_i32_98 dim 1 : vector<8x256xf32>, i32 -> vector<8x256xf32>
    %267 = arith.mulf %266, %90 : vector<8x256xf32>
    %c1_i32_99 = arith.constant 1 : i32
    %268 = tpu.dynamic_rotate %261 by %c1_i32_99 dim 1 : vector<8x256xf32>, i32 -> vector<8x256xf32>
    %269 = arith.mulf %268, %114 : vector<8x256xf32>
    %c255_i32_100 = arith.constant 255 : i32
    %270 = tpu.dynamic_rotate %261 by %c255_i32_100 dim 1 : vector<8x256xf32>, i32 -> vector<8x256xf32>
    %271 = arith.mulf %270, %138 : vector<8x256xf32>
    %c241_i32_101 = arith.constant 241 : i32
    %272 = tpu.dynamic_rotate %261 by %c241_i32_101 dim 1 : vector<8x256xf32>, i32 -> vector<8x256xf32>
    %273 = arith.mulf %272, %162 : vector<8x256xf32>
    %c240_i32_102 = arith.constant 240 : i32
    %274 = tpu.dynamic_rotate %261 by %c240_i32_102 dim 1 : vector<8x256xf32>, i32 -> vector<8x256xf32>
    %275 = arith.mulf %274, %186 : vector<8x256xf32>
    %c239_i32_103 = arith.constant 239 : i32
    %276 = tpu.dynamic_rotate %261 by %c239_i32_103 dim 1 : vector<8x256xf32>, i32 -> vector<8x256xf32>
    %277 = arith.mulf %276, %210 : vector<8x256xf32>
    %278 = tpu.concatenate %263, %265, %267, %269, %261, %271, %273, %275, %277 in 0 : vector<8x256xf32>, vector<8x256xf32>, vector<8x256xf32>, vector<8x256xf32>, vector<8x256xf32>, vector<8x256xf32>, vector<8x256xf32>, vector<8x256xf32>, vector<8x256xf32> -> vector<72x256xf32>
    %cst_104 = arith.constant dense<0.000000e+00> : vector<8x256xf32>
    %279 = tpu.matmul %1, %278, %cst_104 {dimension_numbers = #tpu.dot_dimension_numbers<[1], [0], [0], [1], [0, 0, 1, 1], [], []>} : vector<8x72xf32>, vector<72x256xf32>, vector<8x256xf32> -> vector<8x256xf32>
    %cst_105 = arith.constant dense<0.000000e+00> : vector<8x256xf32>
    %280 = tpu.matmul %224, %279, %cst_105 {dimension_numbers = #tpu.dot_dimension_numbers<[1], [0], [0], [1], [0, 0, 1, 1], [], []>} : vector<8x8xf32>, vector<8x256xf32>, vector<8x256xf32> -> vector<8x256xf32>
    %cst_106 = arith.constant dense<0.000000e+00> : vector<8xf32>
    %281 = vector.multi_reduction <add>, %280, %cst_106 [1] : vector<8x256xf32> to vector<8xf32>
    %282 = vector.shape_cast %281 : vector<8xf32> to vector<8x1xf32>
    %283 = vector.broadcast %282 : vector<8x1xf32> to vector<8x256xf32>
    %284 = arith.subf %279, %283 : vector<8x256xf32>
    %285 = arith.mulf %284, %284 : vector<8x256xf32>
    %cst_107 = arith.constant dense<0.000000e+00> : vector<8x256xf32>
    %286 = tpu.matmul %224, %285, %cst_107 {dimension_numbers = #tpu.dot_dimension_numbers<[1], [0], [0], [1], [0, 0, 1, 1], [], []>} : vector<8x8xf32>, vector<8x256xf32>, vector<8x256xf32> -> vector<8x256xf32>
    %cst_108 = arith.constant dense<0.000000e+00> : vector<8xf32>
    %287 = vector.multi_reduction <add>, %286, %cst_108 [1] : vector<8x256xf32> to vector<8xf32>
    %288 = vector.shape_cast %287 : vector<8xf32> to vector<8x1xf32>
    %cst_109 = arith.constant 9.99999974E-6 : f32
    %289 = vector.broadcast %cst_109 : f32 to vector<8x1xf32>
    %290 = arith.addf %288, %289 : vector<8x1xf32>
    %291 = math.rsqrt %290 : vector<8x1xf32>
    %292 = vector.broadcast %291 : vector<8x1xf32> to vector<8x256xf32>
    %293 = arith.mulf %284, %292 : vector<8x256xf32>
    %294 = arith.mulf %293, %5 : vector<8x256xf32>
    %295 = arith.addf %294, %8 : vector<8x256xf32>
    %cst_110 = arith.constant 0.000000e+00 : f32
    %296 = vector.broadcast %cst_110 : f32 to vector<8x256xf32>
    %297 = arith.maximumf %295, %296 : vector<8x256xf32>
    %298 = arith.addf %0, %297 : vector<8x256xf32>
    %c17_i32_111 = arith.constant 17 : i32
    %299 = tpu.dynamic_rotate %298 by %c17_i32_111 dim 1 : vector<8x256xf32>, i32 -> vector<8x256xf32>
    %300 = arith.mulf %299, %42 : vector<8x256xf32>
    %c16_i32_112 = arith.constant 16 : i32
    %301 = tpu.dynamic_rotate %298 by %c16_i32_112 dim 1 : vector<8x256xf32>, i32 -> vector<8x256xf32>
    %302 = arith.mulf %301, %66 : vector<8x256xf32>
    %c15_i32_113 = arith.constant 15 : i32
    %303 = tpu.dynamic_rotate %298 by %c15_i32_113 dim 1 : vector<8x256xf32>, i32 -> vector<8x256xf32>
    %304 = arith.mulf %303, %90 : vector<8x256xf32>
    %c1_i32_114 = arith.constant 1 : i32
    %305 = tpu.dynamic_rotate %298 by %c1_i32_114 dim 1 : vector<8x256xf32>, i32 -> vector<8x256xf32>
    %306 = arith.mulf %305, %114 : vector<8x256xf32>
    %c255_i32_115 = arith.constant 255 : i32
    %307 = tpu.dynamic_rotate %298 by %c255_i32_115 dim 1 : vector<8x256xf32>, i32 -> vector<8x256xf32>
    %308 = arith.mulf %307, %138 : vector<8x256xf32>
    %c241_i32_116 = arith.constant 241 : i32
    %309 = tpu.dynamic_rotate %298 by %c241_i32_116 dim 1 : vector<8x256xf32>, i32 -> vector<8x256xf32>
    %310 = arith.mulf %309, %162 : vector<8x256xf32>
    %c240_i32_117 = arith.constant 240 : i32
    %311 = tpu.dynamic_rotate %298 by %c240_i32_117 dim 1 : vector<8x256xf32>, i32 -> vector<8x256xf32>
    %312 = arith.mulf %311, %186 : vector<8x256xf32>
    %c239_i32_118 = arith.constant 239 : i32
    %313 = tpu.dynamic_rotate %298 by %c239_i32_118 dim 1 : vector<8x256xf32>, i32 -> vector<8x256xf32>
    %314 = arith.mulf %313, %210 : vector<8x256xf32>
    %315 = tpu.concatenate %300, %302, %304, %306, %298, %308, %310, %312, %314 in 0 : vector<8x256xf32>, vector<8x256xf32>, vector<8x256xf32>, vector<8x256xf32>, vector<8x256xf32>, vector<8x256xf32>, vector<8x256xf32>, vector<8x256xf32>, vector<8x256xf32> -> vector<72x256xf32>
    %cst_119 = arith.constant dense<0.000000e+00> : vector<8x256xf32>
    %316 = tpu.matmul %1, %315, %cst_119 {dimension_numbers = #tpu.dot_dimension_numbers<[1], [0], [0], [1], [0, 0, 1, 1], [], []>} : vector<8x72xf32>, vector<72x256xf32>, vector<8x256xf32> -> vector<8x256xf32>
    %cst_120 = arith.constant dense<0.000000e+00> : vector<8x256xf32>
    %317 = tpu.matmul %224, %316, %cst_120 {dimension_numbers = #tpu.dot_dimension_numbers<[1], [0], [0], [1], [0, 0, 1, 1], [], []>} : vector<8x8xf32>, vector<8x256xf32>, vector<8x256xf32> -> vector<8x256xf32>
    %cst_121 = arith.constant dense<0.000000e+00> : vector<8xf32>
    %318 = vector.multi_reduction <add>, %317, %cst_121 [1] : vector<8x256xf32> to vector<8xf32>
    %319 = vector.shape_cast %318 : vector<8xf32> to vector<8x1xf32>
    %320 = vector.broadcast %319 : vector<8x1xf32> to vector<8x256xf32>
    %321 = arith.subf %316, %320 : vector<8x256xf32>
    %322 = arith.mulf %321, %321 : vector<8x256xf32>
    %cst_122 = arith.constant dense<0.000000e+00> : vector<8x256xf32>
    %323 = tpu.matmul %224, %322, %cst_122 {dimension_numbers = #tpu.dot_dimension_numbers<[1], [0], [0], [1], [0, 0, 1, 1], [], []>} : vector<8x8xf32>, vector<8x256xf32>, vector<8x256xf32> -> vector<8x256xf32>
    %cst_123 = arith.constant dense<0.000000e+00> : vector<8xf32>
    %324 = vector.multi_reduction <add>, %323, %cst_123 [1] : vector<8x256xf32> to vector<8xf32>
    %325 = vector.shape_cast %324 : vector<8xf32> to vector<8x1xf32>
    %cst_124 = arith.constant 9.99999974E-6 : f32
    %326 = vector.broadcast %cst_124 : f32 to vector<8x1xf32>
    %327 = arith.addf %325, %326 : vector<8x1xf32>
    %328 = math.rsqrt %327 : vector<8x1xf32>
    %329 = vector.broadcast %328 : vector<8x1xf32> to vector<8x256xf32>
    %330 = arith.mulf %321, %329 : vector<8x256xf32>
    %331 = arith.mulf %330, %5 : vector<8x256xf32>
    %332 = arith.addf %331, %8 : vector<8x256xf32>
    %cst_125 = arith.constant 0.000000e+00 : f32
    %333 = vector.broadcast %cst_125 : f32 to vector<8x256xf32>
    %334 = arith.maximumf %332, %333 : vector<8x256xf32>
    %c0_126 = arith.constant 0 : index
    %c0_127 = arith.constant 0 : index
    %335 = vector.load %arg3[%c0_126, %c0_127] : memref<8x256xf32, #tpu.memory_space<vmem>>, vector<8x256xf32>
    tpu.vector_store %arg3[%c0_126, %c0_127], %334 {strides = array<i32>} : memref<8x256xf32, #tpu.memory_space<vmem>>, vector<8x256xf32>,
    return
  }
}

</mosaic_0001>

<bundles_post_ra>
// kernel: tile.18
= control target key start
LH: loop header
LB: loop body
LE: loop exit
PB: predicated region body
PF: predicated region fallthrough
CT: control target
= control target key end

     0   :  { %vm7_vm0 = vcmask 31744   ;;  %vm13_vm1 = vcmask 64544   ;;  %s39_s0 = inlined_call_operand.vmem [shape: f32[2,4], index: 0, kind: input, shape index: {}]   ;;  %s40_s1 = inlined_call_operand.vmem [shape: f32[8,1], index: 1, kind: output, shape index: {}]  }
   0x1   :  { %v4_v0 = vld [vmem:[%s39_s0] sm:$0x3]  ;;  %s22_s0 = smov 4  }
   0x2   :  { %5 = vst [vmem:[#allocation1] sm:$0x3] %v4_v0 }
   0x9   :  { %v10_v1 = vld [vmem:[#allocation1 + $0x1] sm:$0x1]   ;;  %v6_v2 = vld [vmem:[#allocation1] sm:$0x1]  }
   0xa   :  { %11 = vrot.lane.b32.xlu0 %v10_v1, %s22_s0  ;;  %8 = vst.msk [vmem:[#allocation0] sm:$0x1] %vm7_vm0, %v6_v2  }
  0x7c   :  { %v12_v3 = vpop.permute.xlu0 %11  }
  0x7d   :  { %14 = vst.msk [vmem:[#allocation0] sm:$0x1] %vm13_vm1, %v12_v3  }
  0x84   :  { %v18_v4 = vld [vmem:[#allocation0] sm:$0x1] }
  0x85   :  { %20 = vst [vmem:[%s40_s1] sm:$0x1] %v18_v4 }

// kernel: tile.13
= control target key start
LH: loop header
LB: loop body
LE: loop exit
PB: predicated region body
PF: predicated region fallthrough
CT: control target
= control target key end

     0   :  { %s22_s0 = inlined_call_operand.vmem [shape: f32[4], index: 0, kind: input, shape index: {}]   ;;  %s23_s1 = inlined_call_operand.vmem [shape: f32[2,4], index: 1, kind: output, shape index: {}]  }
   0x1   :  { %v4_v0 = vld [vmem:[%s22_s0] ss:$0 sm:$0xff] }
   0x2   :  { %5 = vst [vmem:[%s23_s1] sm:$0x3] %v4_v0 }

// kernel: recurrent_block_forward.1
= control target key start
LH: loop header
LB: loop body
LE: loop exit
PB: predicated region body
PF: predicated region fallthrough
CT: control target
= control target key end

     0   :  { %v1135_v1 = vmov 0.0   ;;  %s1136_s14 = smov 16   ;;  %s1137_s15 = smov 17   ;;  %v27_v3 = vlaneseq  ;;  %v1771_v27 = vmov 0  ;;  %v1773_v28 = vmov 0  ;;  %s1747_s0 = inlined_call_operand.vmem [shape: f32[8,256], index: 0, kind: input, shape index: {}]   ;;  %s1748_s1 = inlined_call_operand.vmem [shape: f32[8,72], index: 1, kind: input, shape index: {}]   ;;  %s1749_s2 = inlined_call_operand.vmem [shape: f32[8,2], index: 2, kind: input, shape index: {}]   ;;  %s1750_s3 = inlined_call_operand.vmem [shape: f32[8,256], index: 3, kind: output, shape index: {}]  }
   0x1   :  { %v1169_v0 = vld [vmem:[%s1747_s0] sm:$0xff]  ;;  %281 = vmatprep.mubr.f32.mxu0 %v1135_v1  ;;  %434 = vmatprep.mubr.f32.mxu1 %v1135_v1  ;;  %v1180_v2 = vld [vmem:[%s1747_s0 + $0x8] sm:$0xff]  ;;  %s1138_s18 = smov 15   ;;  %s1139_s19 = smov 1  }
   0x2   :  { %150 = vrot.lane.b32.xlu1 %v1169_v0, %s1136_s14  ;;  %141 = vrot.lane.b32.xlu0 %v1169_v0, %s1137_s15  ;;  %s1140_s0 = smov 127   ;;  %s1141_s20 = smov 113   ;;  %v1211_v4 = vand.u32 127, %v27_v3 }
   0x3   :  { %s1142_s21 = smov 112   ;;  %s1143_s22 = smov 111  }
   0x4   :  { %v30_v5 = vcvt.s32.f32 %v1211_v4  ;;  %v29_v6 = vadd.s32 128, %v1211_v4 }
   0x6   :  { %152 = vrot.lane.b32.xlu1 %v1180_v2, %s1136_s14  ;;  %143 = vrot.lane.b32.xlu0 %v1180_v2, %s1137_s15  ;;  %v32_v7 = vadd.f32 0.5, %v30_v5  ;;  %v31_v8 = vcvt.s32.f32 %v29_v6  ;;  %v133_v6 = vshrl.u32 %v27_v3, 7 }
   0x8   :  { %v34_v9 = vmul.f32 0.0625, %v32_v7  ;;  %v33_v10 = vadd.f32 0.5, %v31_v8 }
   0xa   :  { %161 = vrot.lane.b32.xlu1 %v1180_v2, %s1138_s18  ;;  %159 = vrot.lane.b32.xlu0 %v1169_v0, %s1138_s18  ;;  %v36_v11 = vfloor.f32 %v34_v9  ;;  %v35_v12 = vmul.f32 0.0625, %v33_v10 }
   0xc   :  { %v38_v13 = vmul.f32 16.0, %v36_v11  ;;  %v37_v14 = vfloor.f32 %v35_v12  ;;  %v42_v15 = vadd.f32 -1.0, %v36_v11  ;;  %vm88_vm4 = vcmp.ge.f32.partialorder %v36_v11, 0.0 }
   0xd   :  { %vm90_vm5 = vcmp.le.f32.partialorder %v36_v11, 15.0  ;;  %v106_v32 = vadd.f32 1.0, %v36_v11 }
   0xe   :  { %170 = vrot.lane.b32.xlu1 %v1180_v2, %s1139_s19  ;;  %168 = vrot.lane.b32.xlu0 %v1169_v0, %s1139_s19  ;;  %v1215_v16 = vsub.f32 %v30_v5, %v38_v13  ;;  %v39_v17 = vmul.f32 16.0, %v37_v14  ;;  %vm44_vm0 = vcmp.ge.f32.partialorder %v42_v15, 0.0  ;;  %vm46_vm1 = vcmp.le.f32.partialorder %v42_v15, 15.0  ;;  %vm1239_vm13 = vmand %vm88_vm4, %vm90_vm5 }
   0xf   :  { %vm1222_vm2 = vmand %vm44_vm0, %vm46_vm1  ;;  %v43_v21 = vadd.f32 -1.0, %v37_v14  ;;  %vm89_vm9 = vcmp.ge.f32.partialorder %v37_v14, 0.0  ;;  %vm91_vm10 = vcmp.le.f32.partialorder %v37_v14, 15.0  ;;  %v107_v42 = vadd.f32 1.0, %v37_v14 }
  0x10   :  { %v1218_v18 = vadd.f32 -1.0, %v1215_v16  ;;  %v1220_v19 = vsub.f32 %v31_v8, %v39_v17  ;;  %vm1751_vm3 = vcmp.ge.f32.partialorder %v1215_v16, 0.0  ;;  %v1229_v22 = vadd.f32 1.0, %v1215_v16  ;;  %vm1258_vm4 = vmand %vm89_vm9, %vm91_vm10 }
  0x11   :  { %vm66_vm7 = vmand %vm1222_vm2, %vm1751_vm3  ;;  %vm1753_vm8 = vcmp.le.f32.partialorder %v1215_v16, 15.0  ;;  %vm45_vm11 = vcmp.ge.f32.partialorder %v43_v21, 0.0  ;;  %vm47_vm12 = vcmp.le.f32.partialorder %v43_v21, 15.0  ;;  %v1772_v27 = vsel %vm1258_vm4, 4294967295, %v1771_v27 }
  0x12   :  { %179 = vrot.lane.b32.xlu1 %v1180_v2, %s1140_s0  ;;  %177 = vrot.lane.b32.xlu0 %v1169_v0, %s1140_s0  ;;  %vm1752_vm6 = vcmp.ge.f32.partialorder %v1218_v18, 0.0  ;;  %v1237_v23 = vadd.f32 -1.0, %v1220_v19  ;;  %vm1754_vm15 = vcmp.le.f32.partialorder %v1218_v18, 15.0  ;;  %v1249_v25 = vadd.f32 1.0, %v1220_v19  ;;  %vm1253_vm0 = vmand %vm66_vm7, %vm1753_vm8 }
  0x13   :  { %vm54_vm14 = vmand %vm1222_vm2, %vm1752_vm6  ;;  %vm1756_vm1 = vcmp.ge.f32.partialorder %v1229_v22, 0.0  ;;  %vm1757_vm7 = vcmp.ge.f32.partialorder %v1220_v19, 0.0  ;;  %vm1760_vm10 = vcmp.le.f32.partialorder %v1229_v22, 15.0  ;;  %v1310_v34 = vsel %vm1253_vm0, 1.0, %v1135_v1 }
  0x14   :  { %vm49_vm5 = vmand %vm45_vm11, %vm47_vm12  ;;  %vm1758_vm3 = vcmp.ge.f32.partialorder %v1237_v23, 0.0  ;;  %vm1759_vm8 = vcmp.ge.f32.partialorder %v1249_v25, 0.0  ;;  %vm1764_vm12 = vcmp.le.f32.partialorder %v1237_v23, 15.0  ;;  %vm1785_vm0 = vcmp.le.f32.partialorder %v1218_v18, 15.0 }
  0x15   :  { %vm1265_vm6 = vmand %vm54_vm14, %vm1754_vm15  ;;  %vm1763_vm15 = vcmp.le.f32.partialorder %v1220_v19, 15.0 }
  0x16   :  { %188 = vrot.lane.b32.xlu1 %v1180_v2, %s1141_s20  ;;  %186 = vrot.lane.b32.xlu0 %v1169_v0, %s1141_s20  ;;  %v1774_v28 = vsel %vm1265_vm6, 4294967295, %v1773_v28  ;;  %vm78_vm9 = vmand %vm1222_vm2, %vm1756_vm1  ;;  %vm81_vm6 = vcmp.le.f32.partialorder %v1249_v25, 15.0 }
  0x17   :  { %vm55_vm11 = vmand %vm49_vm5, %vm1758_vm3  ;;  %vm1777_vm3 = vcmp.ge.f32.partialorder %v1218_v18, 0.0 }
  0x18   :  { %vm67_vm14 = vmand %vm49_vm5, %vm1757_vm7 }
  0x19   :  { %vm79_vm4 = vmand %vm49_vm5, %vm1759_vm8  ;;  %vm1761_vm8 = vcmp.lt.s32.totalorder %v1211_v4, 16 }
  0x1a   :  { %197 = vrot.lane.b32.xlu1 %v1180_v2, %s1142_s21  ;;  %195 = vrot.lane.b32.xlu0 %v1169_v0, %s1142_s21  ;;  %vm1287_vm2 = vmand %vm78_vm9, %vm1760_vm10  ;;  %vm1762_vm9 = vcmp.lt.s32.totalorder %v1211_v4, 17 }
  0x1b   :  { %vm59_vm1 = vmand %vm55_vm11, %vm1764_vm12  ;;  %vm1780_vm11 = vnez %v1774_v28  ;;  %v1381_v58 = vsel %vm1287_vm2, 1.0, %v1135_v1 }
  0x1c   :  { %vm71_vm7 = vmand %vm67_vm14, %vm1763_vm15  ;;  %v1315_v35 = vsel %vm1780_vm11, 1.0, %v1135_v1  ;;  %v1318_v36 = vsel %vm59_vm1, 1.0, %v1135_v1  ;;  %vm108_vm1 = vcmp.ge.f32.partialorder %v106_v32, 0.0 }
  0x1d   :  { %vm94_vm5 = vmand %vm1239_vm13, %vm1777_vm3  ;;  %v1321_v37 = vsel %vm71_vm7, 1.0, %v1135_v1  ;;  %vm1781_vm3 = vcmp.ge.f32.partialorder %v1237_v23, 0.0  ;;  %vm110_vm7 = vcmp.le.f32.partialorder %v106_v32, 15.0 }
  0x1e   :  { %206 = vrot.lane.b32.xlu1 %v1180_v2, %s1143_s22  ;;  %204 = vrot.lane.b32.xlu0 %v1169_v0, %s1143_s22  ;;  %vm1303_vm10 = vmand %vm79_vm4, %vm81_vm6  ;;  %vm1782_vm4 = vnez %v1772_v27 }
  0x1f   :  { %vm1327_vm14 = vmand %vm1782_vm4, %vm1781_vm3  ;;  %v1386_v59 = vsel %vm1303_vm10, 1.0, %v1135_v1 }
  0x20   :  { %vm1333_vm11 = vmand %vm94_vm5, %vm1785_vm0  ;;  %vm1788_vm5 = vcmp.ge.f32.partialorder %v1229_v22, 0.0 }
  0x21   :  { %vm100_vm3 = vmand %vm1239_vm13, %vm1788_vm5  ;;  %vm1791_vm13 = vcmp.ge.f32.partialorder %v1249_v25, 0.0  ;;  %v1402_v63 = vsel %vm1333_vm11, 1.0, %v1135_v1  ;;  %vm181_vm11 = vcmp.lt.s32.totalorder %v1211_v4, 127 }
  0x22   :  { %vm1357_vm0 = vmand %vm1327_vm14, %vm1764_vm12  ;;  %vm109_vm14 = vcmp.ge.f32.partialorder %v107_v42, 0.0  ;;  %vm111_vm12 = vcmp.le.f32.partialorder %v107_v42, 15.0 }
  0x23   :  { %vm101_vm5 = vmand %vm1782_vm4, %vm1791_vm13  ;;  %v1407_v5 = vsel %vm1357_vm0, 1.0, %v1135_v1  ;;  %vm1807_vm13 = vcmp.le.f32.partialorder %v1218_v18, 15.0 }
  0x24   :  { %vm1391_vm4 = vmand %vm101_vm5, %vm81_vm6 }
  0x25   :  { %vm1409_vm10 = vmand %vm109_vm14, %vm111_vm12  ;;  %vm1804_vm12 = vcmp.ge.f32.partialorder %v1237_v23, 0.0  ;;  %v1442_v20 = vsel %vm1391_vm4, 1.0, %v1135_v1  ;;  %vm1810_vm14 = vcmp.ge.f32.partialorder %v1215_v16, 0.0  ;;  %vm1811_vm4 = vcmp.ge.f32.partialorder %v1220_v19, 0.0 }
  0x26   :  { %vm1430_vm0 = vmand %vm1409_vm10, %vm1804_vm12 }
  0x74   :  { %v151_v30 = vpop.permute.xlu1 %150  ;;  %v142_v31 = vpop.permute.xlu0 %141 }
  0x78   :  { %v153_v39 = vpop.permute.xlu1 %152  ;;  %v144_v40 = vpop.permute.xlu0 %143 }
  0x79   :  { %v155_v43 = vsel %vm1761_vm8, %v151_v30, %v153_v39  ;;  %v156_v44 = vsel %vm1761_vm8, %v153_v39, %v151_v30  ;;  %v146_v45 = vsel %vm1762_vm9, %v142_v31, %v144_v40  ;;  %v147_v46 = vsel %vm1762_vm9, %v144_v40, %v142_v31  ;;  %vm1374_vm8 = vmand %vm108_vm1, %vm110_vm7 }
  0x7a   :  { %v157_v47 = vmul.f32 %v156_v44, %v1310_v34  ;;  %v148_v48 = vmul.f32 %v147_v46, %v1315_v35  ;;  %v149_v49 = vmul.f32 %v146_v45, %v1318_v36  ;;  %v158_v50 = vmul.f32 %v155_v43, %v1321_v37 }
  0x7b   :  { %vm1792_vm9 = vcmp.le.f32.partialorder %v1229_v22, 15.0  ;;  %vm1799_vm1 = vcmp.lt.s32.totalorder %v1211_v4, 15  ;;  %vm1803_vm7 = vcmp.ge.f32.partialorder %v1218_v18, 0.0 }
  0x7c   :  { %v162_v52 = vpop.permute.xlu1 %161  ;;  %v160_v53 = vpop.permute.xlu0 %159  ;;  %v1067_v54 = vpack.c.bf16 %v158_v50, %v149_v49  ;;  %v1069_v55 = vpack.c.bf16 %v157_v47, %v148_v48  ;;  %vm1368_vm15 = vmand %vm100_vm3, %vm1792_vm9  ;;  %vm172_vm9 = vcmp.lt.s32.totalorder %v1211_v4, 1 }
  0x7d   :  { %v164_v61 = vsel %vm1799_vm1, %v160_v53, %v162_v52  ;;  %vm1800_vm2 = vmmov %vm1799_vm1  ;;  %v1437_v17 = vsel %vm1368_vm15, 1.0, %v1135_v1 }
  0x7e   :  { %1068 = vmatprep.subr.bf16.mxu0 %v1067_v54  ;;  %v165_v62 = vsel %vm1800_vm2, %v162_v52, %v160_v53  ;;  %vm114_vm3 = vmand %vm1374_vm8, %vm1803_vm7  ;;  %v167_v12 = vmul.f32 %v164_v61, %v1386_v59  ;;  %vm1812_vm2 = vcmp.le.f32.partialorder %v1237_v23, 15.0 }
  0x7f   :  { %1070 = vmatpush1.bf16.msra.mxu0 %v1069_v55  ;;  %v166_v11 = vmul.f32 %v165_v62, %v1381_v58  ;;  %vm1446_vm5 = vmand %vm114_vm3, %vm1807_vm13  ;;  %vm1813_vm3 = vcmp.le.f32.partialorder %v1215_v16, 15.0  ;;  %vm190_vm13 = vcmp.lt.s32.totalorder %v1211_v4, 113  ;;  %v1536_v62 = vld [vmem:[%s1748_s1] sm:$0xff] }
  0x80   :  { %v171_v7 = vpop.permute.xlu1 %170  ;;  %v169_v8 = vpop.permute.xlu0 %168  ;;  %vm120_vm15 = vmand %vm1374_vm8, %vm1810_vm14  ;;  %vm1816_vm14 = vcmp.le.f32.partialorder %v1220_v19, 15.0  ;;  %v1486_v16 = vsel %vm1446_vm5, 1.0, %v1135_v1 }
  0x81   :  { %v173_v9 = vsel %vm172_vm9, %v169_v8, %v171_v7  ;;  %v174_v10 = vsel %vm172_vm9, %v171_v7, %v169_v8  ;;  %vm121_vm1 = vmand %vm1409_vm10, %vm1811_vm4  ;;  %v134_v7 = vsub.s32 %v133_v6, %v1211_v4 }
  0x82   :  { %v175_v13 = vmul.f32 %v174_v10, %v1402_v63  ;;  %v176_v14 = vmul.f32 %v173_v9, %v1407_v5  ;;  %vm117_vm7 = vmand %vm1430_vm0, %vm1812_vm2  ;;  %vm1817_vm0 = vcmp.ge.f32.partialorder %v1249_v25, 0.0 }
  0x83   :  { %vm1470_vm12 = vmand %vm120_vm15, %vm1813_vm3  ;;  %v1489_v23 = vsel %vm117_vm7, 1.0, %v1135_v1  ;;  %vm199_vm15 = vcmp.lt.s32.totalorder %v1211_v4, 112  ;;  %vm1818_vm3 = vcmp.ge.f32.partialorder %v1229_v22, 0.0  ;;  %vm208_vm7 = vcmp.lt.s32.totalorder %v1211_v4, 111 }
  0x84   :  { %v180_v24 = vpop.permute.xlu1 %179  ;;  %v178_v26 = vpop.permute.xlu0 %177  ;;  %v1071_v27 = vpack.c.bf16 %v176_v14, %v167_v12  ;;  %v1073_v28 = vpack.c.bf16 %v175_v13, %v166_v11  ;;  %vm123_vm4 = vmand %vm121_vm1, %vm1816_vm14  ;;  %v1503_v42 = vsel %vm1470_vm12, 1.0, %v1135_v1  ;;  %vm135_vm12 = vcmp.eq.s32.totalorder %v134_v7, 0 }
  0x85   :  { %v182_v29 = vsel %vm181_vm11, %v178_v26, %v180_v24  ;;  %v183_v30 = vsel %vm181_vm11, %v180_v24, %v178_v26  ;;  %vm127_vm2 = vmand %vm1409_vm10, %vm1817_vm0  ;;  %v1506_v43 = vsel %vm123_vm4, 1.0, %v1135_v1  ;;  %vm1819_vm10 = vcmp.le.f32.partialorder %v1229_v22, 15.0 }
  0x86   :  { %v184_v18 = vmul.f32 %v182_v29, %v1437_v17  ;;  %v185_v31 = vmul.f32 %v183_v30, %v1442_v20  ;;  %1072 = vmatprep.subr.bf16.mxu0 %v1071_v27  ;;  %vm126_vm1 = vmand %vm1374_vm8, %vm1818_vm3  ;;  %vm136_vm14 = vcmp.eq.s32.totalorder %v134_v7, 4  ;;  %vm138_vm0 = vcmp.eq.s32.totalorder %v134_v7, 4294967292  ;;  %v17_v27 = vld [vmem:[%s1749_s2] sm:$0xff] }
  0x87   :  { %1074 = vmatpush1.bf16.msra.mxu0 %v1073_v28  ;;  %vm129_vm8 = vmand %vm127_vm2, %vm81_vm6  ;;  %vm213_vm6 = vcmask 588800   ;;  %vm288_vm3 = vcmask 64512   ;;  %v1144_v26 = vmov 0   ;;  %v1145_v28 = vmov 1  }
  0x88   :  { %v189_v33 = vpop.permute.xlu1 %188  ;;  %v187_v38 = vpop.permute.xlu0 %186  ;;  %v1075_v39 = vpack.c.bf16 %v185_v31, %v1180_v2  ;;  %v1077_v40 = vpack.c.bf16 %v184_v18, %v1169_v0  ;;  %vm128_vm5 = vmand %vm126_vm1, %vm1819_vm10  ;;  %v1522_v51 = vsel %vm129_vm8, 1.0, %v1135_v1  ;;  %1126 = vset.pattern.permute.xlu0 %v1144_v26  ;;  %1127 = vset.pattern.permute.xlu1 %v1145_v28  ;;  %vm1820_vm1 = vcmp.lt.s32.totalorder %v1211_v4, 17 }
  0x89   :  { %v191_v19 = vsel %vm190_vm13, %v187_v38, %v189_v33  ;;  %v192_v41 = vsel %vm190_vm13, %v189_v33, %v187_v38  ;;  %v1525_v54 = vsel %vm128_vm5, 1.0, %v1135_v1  ;;  %vm137_vm4 = vmor %vm135_vm12, %vm136_vm14  ;;  %vm1822_vm10 = vcmp.lt.s32.totalorder %v1211_v4, 16 }
  0x8a   :  { %1076 = vmatprep.subr.bf16.mxu0 %v1075_v39  ;;  %v193_v48 = vmul.f32 %v191_v19, %v1486_v16  ;;  %v194_v49 = vmul.f32 %v192_v41, %v1489_v23  ;;  %vm139_vm2 = vmor %vm137_vm4, %vm138_vm0  ;;  %vm1824_vm12 = vcmp.lt.s32.totalorder %v1211_v4, 15 }
  0x8b   :  { %1078 = vmatpush1.bf16.msra.mxu0 %v1077_v40  ;;  %v1544_v10 = vsel %vm139_vm2, 0.001953125, %v1135_v1  ;;  %vm1821_vm8 = vmmov %vm1820_vm1 }
  0x8c   :  { %v198_v44 = vpop.permute.xlu1 %197  ;;  %v196_v45 = vpop.permute.xlu0 %195  ;;  %vm1823_vm5 = vmmov %vm1822_vm10 }
  0x8d   :  { %v200_v46 = vsel %vm199_vm15, %v196_v45, %v198_v44  ;;  %v201_v47 = vsel %vm199_vm15, %v198_v44, %v196_v45  ;;  %vm1825_vm14 = vmmov %vm1824_vm12 }
  0x8e   :  { %v202_v50 = vmul.f32 %v200_v46, %v1503_v42  ;;  %v203_v25 = vmul.f32 %v201_v47, %v1506_v43  ;;  %vm1826_vm4 = vmmov %vm1820_vm1 }
  0x8f   :  { %vm1827_vm0 = vmmov %vm1820_vm1 }
  0x90   :  { %v207_v52 = vpop.permute.xlu1 %206  ;;  %v1079_v53 = vpack.c.bf16 %v203_v25, %v194_v49  ;;  %v205_v22 = vpop.permute.xlu0 %204  ;;  %v1081_v55 = vpack.c.bf16 %v202_v50, %v193_v48  ;;  %vm1828_vm2 = vmmov %vm1823_vm5 }
  0x91   :  { %v209_v56 = vsel %vm208_vm7, %v205_v22, %v207_v52  ;;  %v210_v57 = vsel %vm208_vm7, %v207_v52, %v205_v22 }
  0x92   :  { %1080 = vmatprep.subr.bf16.mxu0 %v1079_v53  ;;  %v212_v60 = vmul.f32 %v210_v57, %v1522_v51  ;;  %v211_v61 = vmul.f32 %v209_v56, %v1525_v54 }
  0x93   :  { %1082 = vmatpush1.bf16.msra.mxu0 %v1081_v55 }
  0x94   :  { %233 = vmatprep.subr.mxu0 %v212_v60 }
  0x97   :  { %234 = vmatpush1.msra.mxu0 %v211_v61 }
  0x98   :  { %1058 = vmatmul.mubr.msk.f32.vlgmr.msra.gmra.mrb[0].mxu0 %vm213_vm6, %v1536_v62 }
  0x99   :  { %356 = vmatprep.mubr.f32.mxu0 %v1135_v1 }
 0x16b   :  { %v283_v8 = vpop.f32.mrb[0].mxu0 }
 0x16c   :  { %v285_v9 = vpop.f32.mrb[1].mxu0 }
 0x16d   :  { %292 = vmatprep.subr.mxu0 %v285_v9 }
 0x16e   :  { %293 = vmatpush1.msra.mxu0 %v283_v8 }
 0x16f   :  { %1059 = vmatmul.mubr.msk.f32.vlgmr.msra.gmra.mrb[2].mxu0 %vm288_vm3, %v1544_v10 }
 0x170   :  { %655 = vmatprep.mubr.f32.mxu0 %v1135_v1 }
 0x242   :  { %v358_v3 = vpop.f32.mrb[2].mxu0 }
 0x243   :  { %v360_v11 = vpop.f32.mrb[3].mxu0 }
 0x244   :  { %v363_v12 = vadd.f32 %v360_v11, %v358_v3 }
 0x246   :  { %364 = vadd.xlane.f32.xlu0 %v363_v12 }
 0x25c   :  { %20 = vperm.xlu0 %1126, %v17_v27  }
 0x260   :  { %1128 = vset.pattern.permute.xlu0 %v1145_v28 }
 0x2d3   :  { %v365_v13 = vpop.xlane.xlu0 %364 }
 0x2d4   :  { %v366_v14 = vsub.f32 %v283_v8, %v365_v13  ;;  %v367_v15 = vsub.f32 %v285_v9, %v365_v13 }
 0x2d6   :  { %v369_v21 = vmul.f32 %v367_v15, %v367_v15  ;;  %v368_v24 = vmul.f32 %v366_v14, %v366_v14 }
 0x2d8   :  { %370 = vmatprep.subr.mxu1 %v369_v21 }
 0x2d9   :  { %371 = vmatpush1.msra.mxu1 %v368_v24 }
 0x2da   :  { %1060 = vmatmul.mubr.msk.f32.vlgmr.msra.gmra.mrb[0].mxu1 %vm288_vm3, %v1544_v10 }
 0x2db   :  { %584 = vmatprep.mubr.f32.mxu1 %v1135_v1  ;;  %v1555_v38 = vpop.permute.xlu0 %20 }
 0x3ad   :  { %v436_v29 = vpop.f32.mrb[0].mxu1 }
 0x3ae   :  { %v438_v30 = vpop.f32.mrb[1].mxu1 }
 0x3af   :  { %v441_v18 = vadd.f32 %v438_v30, %v436_v29 }
 0x3b1   :  { %442 = vadd.xlane.f32.xlu1 %v441_v18 }
 0x3c2   :  { %24 = vperm.xlu1 %1127, %v17_v27  }
 0x43e   :  { %v443_v31 = vpop.xlane.xlu1 %442 }
 0x43f   :  { %v444_v32 = vadd.f32 1e-05, %v443_v31 }
 0x441   :  { %1129 = vrsqrt.f32 %v444_v32 }
 0x442   :  { %v1557_v19 = vpop.permute.xlu1 %24 }
 0x44b   :  { %v1130_v33 = vpop.eup %1129 }
 0x44c   :  { %v446_v39 = vmul.f32 %v1130_v33, %v366_v14  ;;  %v447_v40 = vmul.f32 %v1130_v33, %v367_v15 }
 0x44e   :  { %v448_v41 = vmul.f32 %v446_v39, %v1555_v38  ;;  %v449_v44 = vmul.f32 %v447_v40, %v1555_v38 }
 0x450   :  { %v450_v45 = vadd.f32 %v448_v41, %v1557_v19  ;;  %v451_v46 = vadd.f32 %v449_v44, %v1557_v19 }
 0x452   :  { %v452_v47 = vmax.f32 %v450_v45, 0.0  ;;  %v453_v48 = vmax.f32 %v451_v46, 0.0 }
 0x454   :  { %v1564_v49 = vadd.f32 %v452_v47, %v1169_v0  ;;  %v455_v50 = vadd.f32 %v453_v48, %v1180_v2 }
 0x456   :  { %480 = vrot.lane.b32.xlu0 %v1564_v49, %s1139_s19  ;;  %456 = vrot.lane.b32.xlu1 %v1564_v49, %s1137_s15 }
 0x45a   :  { %488 = vrot.lane.b32.xlu0 %v1564_v49, %s1140_s0  ;;  %458 = vrot.lane.b32.xlu1 %v455_v50, %s1137_s15 }
 0x45e   :  { %496 = vrot.lane.b32.xlu0 %v1564_v49, %s1141_s20  ;;  %464 = vrot.lane.b32.xlu1 %v1564_v49, %s1136_s14 }
 0x462   :  { %504 = vrot.lane.b32.xlu0 %v1564_v49, %s1142_s21  ;;  %466 = vrot.lane.b32.xlu1 %v455_v50, %s1136_s14 }
 0x466   :  { %512 = vrot.lane.b32.xlu0 %v1564_v49, %s1143_s22  ;;  %472 = vrot.lane.b32.xlu1 %v1564_v49, %s1138_s18 }
 0x46a   :  { %474 = vrot.lane.b32.xlu1 %v455_v50, %s1138_s18 }
 0x46e   :  { %482 = vrot.lane.b32.xlu1 %v455_v50, %s1139_s19 }
 0x472   :  { %490 = vrot.lane.b32.xlu1 %v455_v50, %s1140_s0 }
 0x476   :  { %498 = vrot.lane.b32.xlu1 %v455_v50, %s1141_s20 }
 0x47a   :  { %506 = vrot.lane.b32.xlu1 %v455_v50, %s1142_s21 }
 0x47e   :  { %514 = vrot.lane.b32.xlu1 %v455_v50, %s1143_s22 }
 0x4c8   :  { %v457_v25 = vpop.permute.xlu1 %456  ;;  %v481_v9 = vpop.permute.xlu0 %480 }
 0x4cc   :  { %v459_v52 = vpop.permute.xlu1 %458  ;;  %v489_v14 = vpop.permute.xlu0 %488 }
 0x4cd   :  { %v460_v22 = vsel %vm1820_vm1, %v457_v25, %v459_v52  ;;  %v461_v55 = vsel %vm1821_vm8, %v459_v52, %v457_v25  ;;  %vm1829_vm1 = vmmov %vm1828_vm2 }
 0x4ce   :  { %v462_v61 = vmul.f32 %v461_v55, %v1315_v35  ;;  %v463_v6 = vmul.f32 %v460_v22, %v1318_v36  ;;  %vm1830_vm8 = vmmov %vm1824_vm12 }
 0x4d0   :  { %v465_v53 = vpop.permute.xlu1 %464  ;;  %v497_v31 = vpop.permute.xlu0 %496 }
 0x4d4   :  { %v467_v56 = vpop.permute.xlu1 %466  ;;  %v505_v25 = vpop.permute.xlu0 %504 }
 0x4d5   :  { %v468_v57 = vsel %vm1822_vm10, %v465_v53, %v467_v56  ;;  %v469_v60 = vsel %vm1823_vm5, %v467_v56, %v465_v53  ;;  %vm1831_vm10 = vmmov %vm1830_vm8 }
 0x4d6   :  { %v470_v7 = vmul.f32 %v469_v60, %v1310_v34  ;;  %v471_v8 = vmul.f32 %v468_v57, %v1321_v37 }
 0x4d8   :  { %v1085_v3 = vpack.c.bf16 %v470_v7, %v462_v61  ;;  %v473_v11 = vpop.permute.xlu1 %472  ;;  %v1083_v12 = vpack.c.bf16 %v471_v8, %v463_v6  ;;  %v513_v61 = vpop.permute.xlu0 %512 }
 0x4da   :  { %1084 = vmatprep.subr.bf16.mxu1 %v1083_v12 }
 0x4db   :  { %1086 = vmatpush1.bf16.msra.mxu1 %v1085_v3 }
 0x4dc   :  { %v475_v13 = vpop.permute.xlu1 %474 }
 0x4dd   :  { %v476_v15 = vsel %vm1824_vm12, %v473_v11, %v475_v13  ;;  %v477_v21 = vsel %vm1825_vm14, %v475_v13, %v473_v11 }
 0x4de   :  { %v478_v28 = vmul.f32 %v477_v21, %v1381_v58  ;;  %v479_v29 = vmul.f32 %v476_v15, %v1386_v59 }
 0x4e0   :  { %v483_v24 = vpop.permute.xlu1 %482 }
 0x4e1   :  { %v484_v26 = vsel %vm172_vm9, %v481_v9, %v483_v24  ;;  %v485_v27 = vsel %vm172_vm9, %v483_v24, %v481_v9 }
 0x4e2   :  { %v486_v30 = vmul.f32 %v485_v27, %v1402_v63  ;;  %v487_v18 = vmul.f32 %v484_v26, %v1407_v5 }
 0x4e4   :  { %v1089_v32 = vpack.c.bf16 %v486_v30, %v478_v28  ;;  %v491_v33 = vpop.permute.xlu1 %490  ;;  %v1087_v39 = vpack.c.bf16 %v487_v18, %v479_v29 }
 0x4e5   :  { %v492_v40 = vsel %vm181_vm11, %v489_v14, %v491_v33  ;;  %v493_v41 = vsel %vm181_vm11, %v491_v33, %v489_v14 }
 0x4e6   :  { %v494_v44 = vmul.f32 %v492_v40, %v1437_v17  ;;  %v495_v45 = vmul.f32 %v493_v41, %v1442_v20  ;;  %1088 = vmatprep.subr.bf16.mxu1 %v1087_v39 }
 0x4e7   :  { %1090 = vmatpush1.bf16.msra.mxu1 %v1089_v32 }
 0x4e8   :  { %v1093_v46 = vpack.c.bf16 %v494_v44, %v1564_v49  ;;  %v499_v47 = vpop.permute.xlu1 %498  ;;  %v1091_v48 = vpack.c.bf16 %v495_v45, %v455_v50 }
 0x4e9   :  { %v500_v52 = vsel %vm190_vm13, %v497_v31, %v499_v47  ;;  %v501_v53 = vsel %vm190_vm13, %v499_v47, %v497_v31 }
 0x4ea   :  { %1092 = vmatprep.subr.bf16.mxu1 %v1091_v48  ;;  %v502_v49 = vmul.f32 %v500_v52, %v1486_v16  ;;  %v503_v50 = vmul.f32 %v501_v53, %v1489_v23 }
 0x4eb   :  { %1094 = vmatpush1.bf16.msra.mxu1 %v1093_v46 }
 0x4ec   :  { %v507_v22 = vpop.permute.xlu1 %506 }
 0x4ed   :  { %v508_v55 = vsel %vm199_vm15, %v505_v25, %v507_v22  ;;  %v509_v56 = vsel %vm199_vm15, %v507_v22, %v505_v25 }
 0x4ee   :  { %v510_v57 = vmul.f32 %v508_v55, %v1503_v42  ;;  %v511_v60 = vmul.f32 %v509_v56, %v1506_v43 }
 0x4f0   :  { %v1097_v6 = vpack.c.bf16 %v510_v57, %v502_v49  ;;  %v515_v7 = vpop.permute.xlu1 %514  ;;  %v1095_v8 = vpack.c.bf16 %v511_v60, %v503_v50 }
 0x4f1   :  { %v517_v9 = vsel %vm208_vm7, %v515_v7, %v513_v61  ;;  %v516_v3 = vsel %vm208_vm7, %v513_v61, %v515_v7 }
 0x4f2   :  { %v519_v11 = vmul.f32 %v517_v9, %v1522_v51  ;;  %1096 = vmatprep.subr.bf16.mxu1 %v1095_v8  ;;  %v518_v12 = vmul.f32 %v516_v3, %v1525_v54 }
 0x4f3   :  { %1098 = vmatpush1.bf16.msra.mxu1 %v1097_v6 }
 0x4f4   :  { %536 = vmatprep.subr.mxu1 %v519_v11 }
 0x4f7   :  { %537 = vmatpush1.msra.mxu1 %v518_v12 }
 0x4f8   :  { %1061 = vmatmul.mubr.msk.f32.vlgmr.msra.gmra.mrb[2].mxu1 %vm213_vm6, %v1536_v62 }
 0x4f9   :  { %883 = vmatprep.mubr.f32.mxu1 %v1135_v1 }
 0x5cb   :  { %v586_v13 = vpop.f32.mrb[2].mxu1 }
 0x5cc   :  { %v588_v14 = vpop.f32.mrb[3].mxu1 }
 0x5cd   :  { %591 = vmatprep.subr.mxu0 %v588_v14 }
 0x5ce   :  { %592 = vmatpush1.msra.mxu0 %v586_v13 }
 0x5cf   :  { %1062 = vmatmul.mubr.msk.f32.vlgmr.msra.gmra.mrb[4].mxu0 %vm288_vm3, %v1544_v10 }
 0x5d0   :  { %733 = vmatprep.mubr.f32.mxu0 %v1135_v1 }
 0x6a2   :  { %v657_v15 = vpop.f32.mrb[4].mxu0 }
 0x6a3   :  { %v659_v21 = vpop.f32.mrb[5].mxu0 }
 0x6a4   :  { %v662_v24 = vadd.f32 %v659_v21, %v657_v15 }
 0x6a6   :  { %663 = vadd.xlane.f32.xlu0 %v662_v24 }
 0x733   :  { %v664_v26 = vpop.xlane.xlu0 %663 }
 0x734   :  { %v665_v27 = vsub.f32 %v586_v13, %v664_v26  ;;  %v666_v28 = vsub.f32 %v588_v14, %v664_v26 }
 0x736   :  { %v667_v29 = vmul.f32 %v665_v27, %v665_v27  ;;  %v668_v30 = vmul.f32 %v666_v28, %v666_v28 }
 0x738   :  { %669 = vmatprep.subr.mxu0 %v668_v30 }
 0x739   :  { %670 = vmatpush1.msra.mxu0 %v667_v29 }
 0x73a   :  { %1063 = vmatmul.mubr.msk.f32.vlgmr.msra.gmra.mrb[6].mxu0 %vm288_vm3, %v1544_v10 }
 0x73b   :  { %954 = vmatprep.mubr.f32.mxu0 %v1135_v1 }
 0x80d   :  { %v735_v18 = vpop.f32.mrb[6].mxu0 }
 0x80e   :  { %v737_v31 = vpop.f32.mrb[7].mxu0 }
 0x80f   :  { %v740_v32 = vadd.f32 %v737_v31, %v735_v18 }
 0x811   :  { %741 = vadd.xlane.f32.xlu1 %v740_v32 }
 0x89e   :  { %v742_v33 = vpop.xlane.xlu1 %741 }
 0x89f   :  { %v743_v39 = vadd.f32 1e-05, %v742_v33 }
 0x8a1   :  { %1131 = vrsqrt.f32 %v743_v39 }
 0x8ab   :  { %v1132_v40 = vpop.eup %1131 }
 0x8ac   :  { %v745_v41 = vmul.f32 %v1132_v40, %v665_v27  ;;  %v746_v44 = vmul.f32 %v1132_v40, %v666_v28 }
 0x8ae   :  { %v747_v45 = vmul.f32 %v745_v41, %v1555_v38  ;;  %v748_v46 = vmul.f32 %v746_v44, %v1555_v38 }
 0x8b0   :  { %v749_v47 = vadd.f32 %v747_v45, %v1557_v19  ;;  %v750_v48 = vadd.f32 %v748_v46, %v1557_v19 }
 0x8b2   :  { %v751_v25 = vmax.f32 %v749_v47, 0.0  ;;  %v752_v52 = vmax.f32 %v750_v48, 0.0 }
 0x8b4   :  { %v1654_v53 = vadd.f32 %v751_v25, %v1169_v0  ;;  %v754_v22 = vadd.f32 %v752_v52, %v1180_v2 }
 0x8b6   :  { %757 = vrot.lane.b32.xlu1 %v754_v22, %s1137_s15  ;;  %755 = vrot.lane.b32.xlu0 %v1654_v53, %s1137_s15 }
 0x8ba   :  { %765 = vrot.lane.b32.xlu1 %v754_v22, %s1136_s14  ;;  %763 = vrot.lane.b32.xlu0 %v1654_v53, %s1136_s14 }
 0x8be   :  { %773 = vrot.lane.b32.xlu1 %v754_v22, %s1138_s18  ;;  %771 = vrot.lane.b32.xlu0 %v1654_v53, %s1138_s18 }
 0x8c2   :  { %781 = vrot.lane.b32.xlu1 %v754_v22, %s1139_s19  ;;  %779 = vrot.lane.b32.xlu0 %v1654_v53, %s1139_s19 }
 0x8c6   :  { %789 = vrot.lane.b32.xlu1 %v754_v22, %s1140_s0  ;;  %787 = vrot.lane.b32.xlu0 %v1654_v53, %s1140_s0 }
 0x8ca   :  { %797 = vrot.lane.b32.xlu1 %v754_v22, %s1141_s20  ;;  %795 = vrot.lane.b32.xlu0 %v1654_v53, %s1141_s20 }
 0x8ce   :  { %805 = vrot.lane.b32.xlu1 %v754_v22, %s1142_s21  ;;  %803 = vrot.lane.b32.xlu0 %v1654_v53, %s1142_s21 }
 0x8d2   :  { %813 = vrot.lane.b32.xlu1 %v754_v22, %s1143_s22  ;;  %811 = vrot.lane.b32.xlu0 %v1654_v53, %s1143_s22 }
 0x928   :  { %v758_v0 = vpop.permute.xlu1 %757  ;;  %v756_v2 = vpop.permute.xlu0 %755 }
 0x929   :  { %v759_v55 = vsel %vm1826_vm4, %v756_v2, %v758_v0  ;;  %v760_v56 = vsel %vm1827_vm0, %v758_v0, %v756_v2 }
 0x92a   :  { %v761_v61 = vmul.f32 %v760_v56, %v1315_v35  ;;  %v762_v6 = vmul.f32 %v759_v55, %v1318_v36 }
 0x92c   :  { %v766_v49 = vpop.permute.xlu1 %765  ;;  %v764_v50 = vpop.permute.xlu0 %763 }
 0x92d   :  { %v767_v57 = vsel %vm1828_vm2, %v764_v50, %v766_v49  ;;  %v768_v60 = vsel %vm1829_vm1, %v766_v49, %v764_v50 }
 0x92e   :  { %v769_v7 = vmul.f32 %v768_v60, %v1310_v34  ;;  %v770_v8 = vmul.f32 %v767_v57, %v1321_v37 }
 0x930   :  { %v1101_v9 = vpack.c.bf16 %v769_v7, %v761_v61  ;;  %v774_v3 = vpop.permute.xlu1 %773  ;;  %v772_v11 = vpop.permute.xlu0 %771  ;;  %v1099_v12 = vpack.c.bf16 %v770_v8, %v762_v6 }
 0x931   :  { %v775_v13 = vsel %vm1830_vm8, %v772_v11, %v774_v3  ;;  %v776_v14 = vsel %vm1831_vm10, %v774_v3, %v772_v11 }
 0x932   :  { %1100 = vmatprep.subr.bf16.mxu1 %v1099_v12  ;;  %v777_v37 = vmul.f32 %v776_v14, %v1381_v58  ;;  %v778_v21 = vmul.f32 %v775_v13, %v1386_v59 }
 0x933   :  { %1102 = vmatpush1.bf16.msra.mxu1 %v1101_v9 }
 0x934   :  { %v782_v15 = vpop.permute.xlu1 %781  ;;  %v780_v35 = vpop.permute.xlu0 %779 }
 0x935   :  { %v783_v36 = vsel %vm172_vm9, %v780_v35, %v782_v15  ;;  %v784_v34 = vsel %vm172_vm9, %v782_v15, %v780_v35 }
 0x936   :  { %v785_v24 = vmul.f32 %v784_v34, %v1402_v63  ;;  %v786_v26 = vmul.f32 %v783_v36, %v1407_v5 }
 0x938   :  { %v1105_v27 = vpack.c.bf16 %v785_v24, %v777_v37  ;;  %v790_v28 = vpop.permute.xlu1 %789  ;;  %v788_v29 = vpop.permute.xlu0 %787  ;;  %v1103_v30 = vpack.c.bf16 %v786_v26, %v778_v21 }
 0x939   :  { %v791_v18 = vsel %vm181_vm11, %v788_v29, %v790_v28  ;;  %v792_v31 = vsel %vm181_vm11, %v790_v28, %v788_v29 }
 0x93a   :  { %v793_v32 = vmul.f32 %v791_v18, %v1437_v17  ;;  %v794_v58 = vmul.f32 %v792_v31, %v1442_v20  ;;  %1104 = vmatprep.subr.bf16.mxu1 %v1103_v30 }
 0x93b   :  { %1106 = vmatpush1.bf16.msra.mxu1 %v1105_v27 }
 0x93c   :  { %v1109_v59 = vpack.c.bf16 %v793_v32, %v1654_v53  ;;  %v798_v63 = vpop.permute.xlu1 %797  ;;  %v796_v5 = vpop.permute.xlu0 %795  ;;  %v1107_v33 = vpack.c.bf16 %v794_v58, %v754_v22 }
 0x93d   :  { %v799_v39 = vsel %vm190_vm13, %v796_v5, %v798_v63  ;;  %v800_v40 = vsel %vm190_vm13, %v798_v63, %v796_v5 }
 0x93e   :  { %1108 = vmatprep.subr.bf16.mxu1 %v1107_v33  ;;  %v801_v45 = vmul.f32 %v799_v39, %v1486_v16  ;;  %v802_v46 = vmul.f32 %v800_v40, %v1489_v23 }
 0x93f   :  { %1110 = vmatpush1.bf16.msra.mxu1 %v1109_v59 }
 0x940   :  { %v806_v41 = vpop.permute.xlu1 %805  ;;  %v804_v44 = vpop.permute.xlu0 %803 }
 0x941   :  { %v807_v17 = vsel %vm199_vm15, %v804_v44, %v806_v41  ;;  %v808_v20 = vsel %vm199_vm15, %v806_v41, %v804_v44 }
 0x942   :  { %v809_v47 = vmul.f32 %v807_v17, %v1503_v42  ;;  %v810_v48 = vmul.f32 %v808_v20, %v1506_v43 }
 0x944   :  { %v1113_v25 = vpack.c.bf16 %v809_v47, %v801_v45  ;;  %v814_v52 = vpop.permute.xlu1 %813  ;;  %v812_v53 = vpop.permute.xlu0 %811  ;;  %v1111_v22 = vpack.c.bf16 %v810_v48, %v802_v46 }
 0x945   :  { %v816_v0 = vsel %vm208_vm7, %v814_v52, %v812_v53  ;;  %v815_v2 = vsel %vm208_vm7, %v812_v53, %v814_v52 }
 0x946   :  { %v818_v55 = vmul.f32 %v816_v0, %v1522_v51  ;;  %1112 = vmatprep.subr.bf16.mxu1 %v1111_v22  ;;  %v817_v16 = vmul.f32 %v815_v2, %v1525_v54 }
 0x947   :  { %1114 = vmatpush1.bf16.msra.mxu1 %v1113_v25 }
 0x948   :  { %835 = vmatprep.subr.mxu1 %v818_v55 }
 0x94b   :  { %836 = vmatpush1.msra.mxu1 %v817_v16 }
 0x94c   :  { %1064 = vmatmul.mubr.msk.f32.vlgmr.msra.gmra.mrb[4].mxu1 %vm213_vm6, %v1536_v62 }
 0xa1f   :  { %v885_v23 = vpop.f32.mrb[4].mxu1 }
 0xa20   :  { %v887_v42 = vpop.f32.mrb[5].mxu1 }
 0xa21   :  { %890 = vmatprep.subr.mxu0 %v887_v42 }
 0xa22   :  { %891 = vmatpush1.msra.mxu0 %v885_v23 }
 0xa23   :  { %1065 = vmatmul.mubr.msk.f32.vlgmr.msra.gmra.mrb[8].mxu0 %vm288_vm3, %v1544_v10 }
 0xa24   :  { %1032 = vmatprep.mubr.f32.mxu0 %v1135_v1 }
 0xaf6   :  { %v956_v4 = vpop.f32.mrb[8].mxu0 }
 0xaf7   :  { %v958_v43 = vpop.f32.mrb[9].mxu0 }
 0xaf8   :  { %v961_v51 = vadd.f32 %v958_v43, %v956_v4 }
 0xafa   :  { %962 = vadd.xlane.f32.xlu0 %v961_v51 }
 0xb87   :  { %v963_v56 = vpop.xlane.xlu0 %962 }
 0xb88   :  { %v964_v49 = vsub.f32 %v885_v23, %v963_v56  ;;  %v965_v54 = vsub.f32 %v887_v42, %v963_v56 }
 0xb8a   :  { %v966_v50 = vmul.f32 %v964_v49, %v964_v49  ;;  %v967_v57 = vmul.f32 %v965_v54, %v965_v54 }
 0xb8c   :  { %968 = vmatprep.subr.mxu0 %v967_v57 }
 0xb8d   :  { %969 = vmatpush1.msra.mxu0 %v966_v50 }
 0xb8e   :  { %1066 = vmatmul.mubr.msk.f32.vlgmr.msra.gmra.mrb[10].mxu0 %vm288_vm3, %v1544_v10 }
 0xc61   :  { %v1034_v62 = vpop.f32.mrb[10].mxu0 }
 0xc62   :  { %v1036_v60 = vpop.f32.mrb[11].mxu0 }
 0xc63   :  { %v1039_v61 = vadd.f32 %v1036_v60, %v1034_v62 }
 0xc65   :  { %1040 = vadd.xlane.f32.xlu1 %v1039_v61 }
 0xcf2   :  { %v1041_v6 = vpop.xlane.xlu1 %1040 }
 0xcf3   :  { %v1042_v1 = vadd.f32 1e-05, %v1041_v6 }
 0xcf5   :  { %1133 = vrsqrt.f32 %v1042_v1 }
 0xcff   :  { %v1134_v7 = vpop.eup %1133 }
 0xd00   :  { %v1044_v8 = vmul.f32 %v1134_v7, %v964_v49  ;;  %v1045_v9 = vmul.f32 %v1134_v7, %v965_v54 }
 0xd02   :  { %v1046_v3 = vmul.f32 %v1044_v8, %v1555_v38  ;;  %v1047_v11 = vmul.f32 %v1045_v9, %v1555_v38 }
 0xd04   :  { %v1048_v12 = vadd.f32 %v1046_v3, %v1557_v19  ;;  %v1049_v13 = vadd.f32 %v1047_v11, %v1557_v19 }
 0xd06   :  { %v1050_v14 = vmax.f32 %v1048_v12, 0.0  ;;  %v1051_v10 = vmax.f32 %v1049_v13, 0.0 }
 0xd08   :  { %1052 = vst [vmem:[%s1750_s3] sm:$0xff] %v1050_v14  ;;  %1053 = vst [vmem:[%s1750_s3 + $0x8] sm:$0xff] %v1051_v10 }

</bundles_post_ra>
